<compile_context>
chip_gen: v5e
topology: v5e:2x2
jax: 0.10.0
libtpu: 0.0.40
codegen_flags: <defaults>
</compile_context>

<pallas_src>
import jax
import jax.numpy as jnp
from jax.experimental import pallas as pl
from jax.experimental.pallas import tpu as pltpu


def _round_up(x, m):
    return (x + m - 1) // m * m


# ---------------------------------------------------------------------------
# Kernel
# ---------------------------------------------------------------------------
def _make_decoder_kernel(num_hidden: int):
    """Kernel ref order: x, (W_0, b_0), ..., (W_{H-1}, b_{H-1}), W_rec, b_rec, out."""

    def kernel(*refs):
        x_ref = refs[0]
        out_ref = refs[-1]
        param_refs = refs[1:-1]

        h = x_ref[...]                              # f32 activations [TM, Zp]

        # Hidden stack: Linear -> ReLU (bf16 MXU operands, f32 accumulate/elementwise).
        for i in range(num_hidden):
            w = param_refs[2 * i][...]              # bf16 [Kp, Np]
            b = param_refs[2 * i + 1][...]          # f32  [1,  Np] -> broadcasts
            acc = jnp.dot(h.astype(w.dtype), w, preferred_element_type=jnp.float32)
            h = jnp.maximum(acc + b, 0.0)

        # Reconstruction: Linear -> Sigmoid (exact).
        w_rec = param_refs[-2][...]
        b_rec = param_refs[-1][...]
        logits = jnp.dot(h.astype(w_rec.dtype), w_rec,
                         preferred_element_type=jnp.float32) + b_rec
        out_ref[...] = (1.0 / (1.0 + jnp.exp(-logits))).astype(out_ref.dtype)

    return kernel


# ---------------------------------------------------------------------------
# One-time parameter preparation (pad + cast once, not per forward call)
# ---------------------------------------------------------------------------
def prepare_decoder_params(hidden_params, rec_params, *,
                           weight_dtype=jnp.bfloat16, lane=128, z_align=8):
    """Pad feature dims (z -> multiple of 8, others -> multiple of 128 lanes)
    and cast weights to `weight_dtype` ONCE.  Zero padding is mathematically
    transparent; padded output columns are sliced off after the kernel."""
    all_params = list(hidden_params) + [rec_params]
    feat_dims = [hidden_params[0][0].shape[0]] + [w.shape[1] for w, _ in all_params]
    padded = [_round_up(feat_dims[0], z_align)] + \
             [_round_up(d, lane) for d in feat_dims[1:]]

    flat = []
    for li, (w, b) in enumerate(all_params):
        kin, kout = w.shape
        kp, np_ = padded[li], padded[li + 1]
        wp = jnp.pad(w, ((0, kp - kin), (0, np_ - kout))).astype(weight_dtype)
        bp = jnp.pad(b.astype(jnp.float32), (0, np_ - kout)).reshape(1, np_)
        flat.append(wp)
        flat.append(bp)

    return {
        "flat": flat,                 # [W0p, b0p, ..., Wrecp, brecp] (device arrays)
        "feat_dims": feat_dims,       # original [z, h1, ..., x_dim]
        "padded_dims": padded,        # padded   [zp, h1p, ..., xdp]
        "num_hidden": len(hidden_params),
    }


# ---------------------------------------------------------------------------
# Tiling choice: few big steps, VMEM-aware, >=2 parallel steps when possible
# ---------------------------------------------------------------------------
def _choose_tiling(batch, padded_dims, param_bytes, block_m=None,
                   max_block_m=1024, vmem_budget=40 << 20):
    b_pad0 = _round_up(batch, 8)
    z_pad, out_pad = padded_dims[0], padded_dims[-1]
    hidden_pads = padded_dims[1:-1]

    # Per-row f32 footprint: double-buffered x/out tiles + activation working set.
    bytes_per_row = 4 * (2 * (z_pad + out_pad) + sum(hidden_pads) + out_pad)
    avail = vmem_budget - param_bytes - (4 << 20)           # headroom
    fit_rows = max(8, (avail // max(bytes_per_row, 1)) // 8 * 8)

    if block_m is None:
        # >=2 grid steps whenever the batch allows so v7x's 2 TensorCores both
        # get work via dimension_semantics=("parallel",); on 1-TC chips two
        # steps still amortize the ~0.35us/step fixed cost essentially fully.
        target_steps = 2 if b_pad0 >= 16 else 1
        block_m = _round_up(pl.cdiv(b_pad0, target_steps), 8)

    block_m = max(8, min(block_m, fit_rows, max_block_m))
    num_steps = pl.cdiv(b_pad0, block_m)
    b_pad = num_steps * block_m
    return block_m, b_pad, num_steps


# ---------------------------------------------------------------------------
# Forward
# ---------------------------------------------------------------------------
def decoder_forward(x, packed, *, block_m=None, single_buffer_params=True):
    """Run the Decoder forward pass.

    Args:
      x: [batch, z_dim] float array.
      packed: output of prepare_decoder_params().
      block_m: optional batch-tile override (rows per grid step).
    Returns:
      [batch, x_dim] float32 in (0, 1).
    """
    num_hidden = packed["num_hidden"]
    flat_params = packed["flat"]
    feat = packed["feat_dims"]
    padded = packed["padded_dims"]

    batch, z_dim = x.shape
    assert z_dim == feat[0], f"x has z_dim={z_dim}, params expect {feat[0]}"
    x_dim = feat[-1]

    param_bytes = sum(int(a.size) * a.dtype.itemsize for a in flat_params)
    block_m, b_pad, num_steps = _choose_tiling(batch, padded, param_bytes, block_m)

    xp = x.astype(jnp.float32)
    if (b_pad, padded[0]) != (batch, z_dim):     # usually a no-op (no host pad emitted)
        xp = jnp.pad(xp, ((0, b_pad - batch), (0, padded[0] - z_dim)))

    # Advisory cost hint for the XLA scheduler.
    flops = 2 * b_pad * sum(padded[i] * padded[i + 1] for i in range(num_hidden + 1))
    bytes_accessed = int(xp.size) * 4 + param_bytes + b_pad * padded[-1] * 4
    cost = pl.CostEstimate(flops=int(flops),
                           transcendentals=int(b_pad * padded[-1]),
                           bytes_accessed=int(bytes_accessed))

    def build(single_buf):
        resident_kwargs = {}
        if single_buf:
            # Constant index_map -> block never changes -> 1 buffer is enough.
            resident_kwargs = dict(pipeline_mode=pl.Buffered(1))

        in_specs = [pl.BlockSpec((block_m, padded[0]), lambda i: (i, 0))]
        for li in range(num_hidden + 1):
            kp, np_ = padded[li], padded[li + 1]
            in_specs.append(pl.BlockSpec((kp, np_), lambda i: (0, 0),
                                         **resident_kwargs))   # weight: VMEM-resident
            in_specs.append(pl.BlockSpec((1, np_), lambda i: (0, 0),
                                         **resident_kwargs))   # bias:   VMEM-resident
        out_spec = pl.BlockSpec((block_m, padded[-1]), lambda i: (i, 0))

        # VMEM budget: double-buffered x/out tiles + activation working set
        # + resident params (x1 if single-buffered, x2 otherwise) + headroom.
        io_tile_bytes = 4 * block_m * (padded[0] + padded[-1])
        act_bytes = 4 * block_m * sum(padded[1:])
        pbytes = param_bytes if single_buf else 2 * param_bytes
        vmem_limit = min(2 * io_tile_bytes + act_bytes + pbytes + (4 << 20),
                         40 << 20)   # stays safe on v7x's 64 MiB VMEM

        return pl.pallas_call(
            _make_decoder_kernel(num_hidden),
            out_shape=jax.ShapeDtypeStruct((b_pad, padded[-1]), jnp.float32),
            grid=(num_steps,),
            in_specs=in_specs,
            out_specs=out_spec,
            compiler_params=pltpu.CompilerParams(
                dimension_semantics=("parallel",),
                vmem_limit_bytes=int(vmem_limit)),
            cost_estimate=cost,
        )

    try:
        out_padded = build(single_buffer_params)(xp, *flat_params)
    except Exception:
        # Fallback: some JAX builds reject pipeline_mode on top-level BlockSpecs;
        # default double-buffered params are correct (just use a bit more VMEM).
        out_padded = build(False)(xp, *flat_params)

    if (b_pad, padded[-1]) != (batch, x_dim):
        out_padded = out_padded[:batch, :x_dim]
    return out_padded


# ---------------------------------------------------------------------------
# Param init + pure-JAX reference
# ---------------------------------------------------------------------------
def init_decoder_params(key, dims):
    """Deterministic init mirroring nn.Linear shapes (weights stored as [in, out])."""
    z_dim, h_dims, x_dim = dims
    neuron_dims = [z_dim, *h_dims]

    hidden_params = []
    for i in range(1, len(neuron_dims)):
        fan_in, fan_out = neuron_dims[i - 1], neuron_dims[i]
        key, kw, kb = jax.random.split(key, 3)
        bound = 1.0 / (fan_in ** 0.5)
        w = jax.random.uniform(kw, (fan_in, fan_out), jnp.float32, -bound, bound)
        b = jax.random.uniform(kb, (fan_out,), jnp.float32, -bound, bound)
        hidden_params.append((w, b))

    fan_in = h_dims[-1]
    key, kw, kb = jax.random.split(key, 3)
    bound = 1.0 / (fan_in ** 0.5)
    w_rec = jax.random.uniform(kw, (fan_in, x_dim), jnp.float32, -bound, bound)
    b_rec = jax.random.uniform(kb, (x_dim,), jnp.float32, -bound, bound)
    return hidden_params, (w_rec, b_rec)


def decoder_reference(x, hidden_params, rec_params, weight_dtype=jnp.bfloat16):
    """Pure-JAX reference mirroring the kernel's bf16-operand / f32-accumulate math."""
    def q(a):
        return a.astype(weight_dtype).astype(jnp.float32)

    h = x.astype(jnp.float32)
    for w, b in hidden_params:
        h = jnp.maximum(q(h) @ q(w) + b, 0.0)
    w_rec, b_rec = rec_params
    return jax.nn.sigmoid(q(h) @ q(w_rec) + b_rec)


if __name__ == "__main__":
    # dims = [z_dim, [hidden_dims], x_dim]
    dims = [8, [32, 64], 128]
    batch = 256                       # -> two 128-row parallel grid steps

    key = jax.random.PRNGKey(0)
    key, kx, kp = jax.random.split(key, 3)

    x = jax.random.normal(kx, (batch, dims[0]), jnp.float32)
    hidden_params, rec_params = init_decoder_params(kp, dims)

    packed = prepare_decoder_params(hidden_params, rec_params)   # pad/cast ONCE
    out = jax.block_until_ready(decoder_forward(x, packed))

    ref = decoder_reference(x, hidden_params, rec_params)
    assert out.shape == (batch, dims[2])
    max_diff = float(jnp.max(jnp.abs(out - ref)))
    # Tolerance covers bf16 operand quantization / accumulation-order differences.
    assert jnp.allclose(out, ref, atol=1e-3, rtol=1e-3), (
        f"mismatch vs reference: max |diff| = {max_diff}")

    print("KERNEL_OK")
</pallas_src>

<mosaic_0001>
module attributes {stable_mosaic.version = 11 : i64} {
  func.func @kernel(%arg0: i32, %arg1: memref<128x8xf32, #tpu.memory_space<vmem>>, %arg2: memref<8x128xbf16, #tpu.memory_space<vmem>>, %arg3: memref<1x128xf32, #tpu.memory_space<vmem>>, %arg4: memref<128x128xbf16, #tpu.memory_space<vmem>>, %arg5: memref<1x128xf32, #tpu.memory_space<vmem>>, %arg6: memref<128x128xbf16, #tpu.memory_space<vmem>>, %arg7: memref<1x128xf32, #tpu.memory_space<vmem>>, %arg8: memref<128x128xf32, #tpu.memory_space<vmem>>) attributes {dimension_semantics = [#tpu.dimension_semantics<parallel>], iteration_bounds = array<i64: 2>, scalar_prefetch = 0 : i64, scratch_operands = 0 : i64, tpu.core_type = #tpu.core_type<tc>, window_params = [{transform_indices = @transform_0, window_bounds = array<i64: 128, 8>}, {pipeline_mode = #tpu.pipeline_mode<synchronous>, transform_indices = @transform_1, window_bounds = array<i64: 8, 128>}, {pipeline_mode = #tpu.pipeline_mode<synchronous>, transform_indices = @transform_2, window_bounds = array<i64: 1, 128>}, {pipeline_mode = #tpu.pipeline_mode<synchronous>, transform_indices = @transform_3, window_bounds = array<i64: 128, 128>}, {pipeline_mode = #tpu.pipeline_mode<synchronous>, transform_indices = @transform_4, window_bounds = array<i64: 1, 128>}, {pipeline_mode = #tpu.pipeline_mode<synchronous>, transform_indices = @transform_5, window_bounds = array<i64: 128, 128>}, {pipeline_mode = #tpu.pipeline_mode<synchronous>, transform_indices = @transform_6, window_bounds = array<i64: 1, 128>}, {transform_indices = @transform_7, window_bounds = array<i64: 128, 128>}]} {
    %c0 = arith.constant 0 : index
    %c0_0 = arith.constant 0 : index
    %0 = vector.load %arg1[%c0, %c0_0] : memref<128x8xf32, #tpu.memory_space<vmem>>, vector<128x8xf32>
    %c0_1 = arith.constant 0 : index
    %c0_2 = arith.constant 0 : index
    %1 = vector.load %arg2[%c0_1, %c0_2] : memref<8x128xbf16, #tpu.memory_space<vmem>>, vector<8x128xbf16>
    %c0_3 = arith.constant 0 : index
    %c0_4 = arith.constant 0 : index
    %2 = vector.load %arg3[%c0_3, %c0_4] : memref<1x128xf32, #tpu.memory_space<vmem>>, vector<1x128xf32>
    %3 = arith.truncf %0 : vector<128x8xf32> to vector<128x8xbf16>
    %cst = arith.constant dense<0.000000e+00> : vector<128x128xf32>
    %4 = tpu.matmul %3, %1, %cst {dimension_numbers = #tpu.dot_dimension_numbers<[1], [0], [0], [1], [0, 0, 1, 1], [], []>} : vector<128x8xbf16>, vector<8x128xbf16>, vector<128x128xf32> -> vector<128x128xf32>
    %5 = vector.broadcast %2 : vector<1x128xf32> to vector<128x128xf32>
    %6 = arith.addf %4, %5 : vector<128x128xf32>
    %cst_5 = arith.constant 0.000000e+00 : f32
    %7 = vector.broadcast %cst_5 : f32 to vector<128x128xf32>
    %8 = arith.maximumf %6, %7 : vector<128x128xf32>
    %c0_6 = arith.constant 0 : index
    %c0_7 = arith.constant 0 : index
    %9 = vector.load %arg4[%c0_6, %c0_7] : memref<128x128xbf16, #tpu.memory_space<vmem>>, vector<128x128xbf16>
    %c0_8 = arith.constant 0 : index
    %c0_9 = arith.constant 0 : index
    %10 = vector.load %arg5[%c0_8, %c0_9] : memref<1x128xf32, #tpu.memory_space<vmem>>, vector<1x128xf32>
    %11 = arith.truncf %8 : vector<128x128xf32> to vector<128x128xbf16>
    %cst_10 = arith.constant dense<0.000000e+00> : vector<128x128xf32>
    %12 = tpu.matmul %11, %9, %cst_10 {dimension_numbers = #tpu.dot_dimension_numbers<[1], [0], [0], [1], [0, 0, 1, 1], [], []>} : vector<128x128xbf16>, vector<128x128xbf16>, vector<128x128xf32> -> vector<128x128xf32>
    %13 = vector.broadcast %10 : vector<1x128xf32> to vector<128x128xf32>
    %14 = arith.addf %12, %13 : vector<128x128xf32>
    %cst_11 = arith.constant 0.000000e+00 : f32
    %15 = vector.broadcast %cst_11 : f32 to vector<128x128xf32>
    %16 = arith.maximumf %14, %15 : vector<128x128xf32>
    %c0_12 = arith.constant 0 : index
    %c0_13 = arith.constant 0 : index
    %17 = vector.load %arg6[%c0_12, %c0_13] : memref<128x128xbf16, #tpu.memory_space<vmem>>, vector<128x128xbf16>
    %c0_14 = arith.constant 0 : index
    %c0_15 = arith.constant 0 : index
    %18 = vector.load %arg7[%c0_14, %c0_15] : memref<1x128xf32, #tpu.memory_space<vmem>>, vector<1x128xf32>
    %19 = arith.truncf %16 : vector<128x128xf32> to vector<128x128xbf16>
    %cst_16 = arith.constant dense<0.000000e+00> : vector<128x128xf32>
    %20 = tpu.matmul %19, %17, %cst_16 {dimension_numbers = #tpu.dot_dimension_numbers<[1], [0], [0], [1], [0, 0, 1, 1], [], []>} : vector<128x128xbf16>, vector<128x128xbf16>, vector<128x128xf32> -> vector<128x128xf32>
    %21 = vector.broadcast %18 : vector<1x128xf32> to vector<128x128xf32>
    %22 = arith.addf %20, %21 : vector<128x128xf32>
    %cst_17 = arith.constant 0.000000e+00 : f32
    %23 = vector.broadcast %cst_17 : f32 to vector<128x128xf32>
    %24 = arith.subf %23, %22 : vector<128x128xf32>
    %25 = math.exp %24 : vector<128x128xf32>
    %cst_18 = arith.constant 1.000000e+00 : f32
    %26 = vector.broadcast %cst_18 : f32 to vector<128x128xf32>
    %27 = arith.addf %26, %25 : vector<128x128xf32>
    %cst_19 = arith.constant 1.000000e+00 : f32
    %28 = vector.broadcast %cst_19 : f32 to vector<128x128xf32>
    %29 = arith.divf %28, %27 : vector<128x128xf32>
    %c0_20 = arith.constant 0 : index
    %c0_21 = arith.constant 0 : index
    %30 = vector.load %arg8[%c0_20, %c0_21] : memref<128x128xf32, #tpu.memory_space<vmem>>, vector<128x128xf32>
    tpu.vector_store %arg8[%c0_20, %c0_21], %29 {strides = array<i32>} : memref<128x128xf32, #tpu.memory_space<vmem>>, vector<128x128xf32>,
    return
  }
  func.func @transform_0(%arg0: i32) -> (i32, i32) {
    %c0_i32 = arith.constant 0 : i32
    %c0_i32_0 = arith.constant 0 : i32
    return %arg0, %c0_i32 : i32, i32
  }
  func.func @transform_1(%arg0: i32) -> (i32, i32) {
    %c0_i32 = arith.constant 0 : i32
    %c0_i32_0 = arith.constant 0 : i32
    %c0_i32_1 = arith.constant 0 : i32
    return %c0_i32, %c0_i32_0 : i32, i32
  }
  func.func @transform_2(%arg0: i32) -> (i32, i32) {
    %c0_i32 = arith.constant 0 : i32
    %c0_i32_0 = arith.constant 0 : i32
    %c0_i32_1 = arith.constant 0 : i32
    return %c0_i32, %c0_i32_0 : i32, i32
  }
  func.func @transform_3(%arg0: i32) -> (i32, i32) {
    %c0_i32 = arith.constant 0 : i32
    %c0_i32_0 = arith.constant 0 : i32
    %c0_i32_1 = arith.constant 0 : i32
    return %c0_i32, %c0_i32_0 : i32, i32
  }
  func.func @transform_4(%arg0: i32) -> (i32, i32) {
    %c0_i32 = arith.constant 0 : i32
    %c0_i32_0 = arith.constant 0 : i32
    %c0_i32_1 = arith.constant 0 : i32
    return %c0_i32, %c0_i32_0 : i32, i32
  }
  func.func @transform_5(%arg0: i32) -> (i32, i32) {
    %c0_i32 = arith.constant 0 : i32
    %c0_i32_0 = arith.constant 0 : i32
    %c0_i32_1 = arith.constant 0 : i32
    return %c0_i32, %c0_i32_0 : i32, i32
  }
  func.func @transform_6(%arg0: i32) -> (i32, i32) {
    %c0_i32 = arith.constant 0 : i32
    %c0_i32_0 = arith.constant 0 : i32
    %c0_i32_1 = arith.constant 0 : i32
    return %c0_i32, %c0_i32_0 : i32, i32
  }
  func.func @transform_7(%arg0: i32) -> (i32, i32) {
    %c0_i32 = arith.constant 0 : i32
    %c0_i32_0 = arith.constant 0 : i32
    return %arg0, %c0_i32 : i32, i32
  }
}

module attributes {stable_mosaic.version = 11 : i64} {
  func.func @kernel(%arg0: i32, %arg1: memref<128x8xf32, #tpu.memory_space<vmem>>, %arg2: memref<8x128xbf16, #tpu.memory_space<vmem>>, %arg3: memref<1x128xf32, #tpu.memory_space<vmem>>, %arg4: memref<128x128xbf16, #tpu.memory_space<vmem>>, %arg5: memref<1x128xf32, #tpu.memory_space<vmem>>, %arg6: memref<128x128xbf16, #tpu.memory_space<vmem>>, %arg7: memref<1x128xf32, #tpu.memory_space<vmem>>, %arg8: memref<128x128xf32, #tpu.memory_space<vmem>>) attributes {dimension_semantics = [#tpu.dimension_semantics<parallel>], iteration_bounds = array<i64: 2>, scalar_prefetch = 0 : i64, scratch_operands = 0 : i64, tpu.core_type = #tpu.core_type<tc>, window_params = [{transform_indices = @transform_0, window_bounds = array<i64: 128, 8>}, {pipeline_mode = #tpu.pipeline_mode<synchronous>, transform_indices = @transform_1, window_bounds = array<i64: 8, 128>}, {pipeline_mode = #tpu.pipeline_mode<synchronous>, transform_indices = @transform_2, window_bounds = array<i64: 1, 128>}, {pipeline_mode = #tpu.pipeline_mode<synchronous>, transform_indices = @transform_3, window_bounds = array<i64: 128, 128>}, {pipeline_mode = #tpu.pipeline_mode<synchronous>, transform_indices = @transform_4, window_bounds = array<i64: 1, 128>}, {pipeline_mode = #tpu.pipeline_mode<synchronous>, transform_indices = @transform_5, window_bounds = array<i64: 128, 128>}, {pipeline_mode = #tpu.pipeline_mode<synchronous>, transform_indices = @transform_6, window_bounds = array<i64: 1, 128>}, {transform_indices = @transform_7, window_bounds = array<i64: 128, 128>}]} {
    %c0 = arith.constant 0 : index
    %c0_0 = arith.constant 0 : index
    %0 = vector.load %arg1[%c0, %c0_0] : memref<128x8xf32, #tpu.memory_space<vmem>>, vector<128x8xf32>
    %c0_1 = arith.constant 0 : index
    %c0_2 = arith.constant 0 : index
    %1 = vector.load %arg2[%c0_1, %c0_2] : memref<8x128xbf16, #tpu.memory_space<vmem>>, vector<8x128xbf16>
    %c0_3 = arith.constant 0 : index
    %c0_4 = arith.constant 0 : index
    %2 = vector.load %arg3[%c0_3, %c0_4] : memref<1x128xf32, #tpu.memory_space<vmem>>, vector<1x128xf32>
    %3 = arith.truncf %0 : vector<128x8xf32> to vector<128x8xbf16>
    %cst = arith.constant dense<0.000000e+00> : vector<128x128xf32>
    %4 = tpu.matmul %3, %1, %cst {dimension_numbers = #tpu.dot_dimension_numbers<[1], [0], [0], [1], [0, 0, 1, 1], [], []>} : vector<128x8xbf16>, vector<8x128xbf16>, vector<128x128xf32> -> vector<128x128xf32>
    %5 = vector.broadcast %2 : vector<1x128xf32> to vector<128x128xf32>
    %6 = arith.addf %4, %5 : vector<128x128xf32>
    %cst_5 = arith.constant 0.000000e+00 : f32
    %7 = vector.broadcast %cst_5 : f32 to vector<128x128xf32>
    %8 = arith.maximumf %6, %7 : vector<128x128xf32>
    %c0_6 = arith.constant 0 : index
    %c0_7 = arith.constant 0 : index
    %9 = vector.load %arg4[%c0_6, %c0_7] : memref<128x128xbf16, #tpu.memory_space<vmem>>, vector<128x128xbf16>
    %c0_8 = arith.constant 0 : index
    %c0_9 = arith.constant 0 : index
    %10 = vector.load %arg5[%c0_8, %c0_9] : memref<1x128xf32, #tpu.memory_space<vmem>>, vector<1x128xf32>
    %11 = arith.truncf %8 : vector<128x128xf32> to vector<128x128xbf16>
    %cst_10 = arith.constant dense<0.000000e+00> : vector<128x128xf32>
    %12 = tpu.matmul %11, %9, %cst_10 {dimension_numbers = #tpu.dot_dimension_numbers<[1], [0], [0], [1], [0, 0, 1, 1], [], []>} : vector<128x128xbf16>, vector<128x128xbf16>, vector<128x128xf32> -> vector<128x128xf32>
    %13 = vector.broadcast %10 : vector<1x128xf32> to vector<128x128xf32>
    %14 = arith.addf %12, %13 : vector<128x128xf32>
    %cst_11 = arith.constant 0.000000e+00 : f32
    %15 = vector.broadcast %cst_11 : f32 to vector<128x128xf32>
    %16 = arith.maximumf %14, %15 : vector<128x128xf32>
    %c0_12 = arith.constant 0 : index
    %c0_13 = arith.constant 0 : index
    %17 = vector.load %arg6[%c0_12, %c0_13] : memref<128x128xbf16, #tpu.memory_space<vmem>>, vector<128x128xbf16>
    %c0_14 = arith.constant 0 : index
    %c0_15 = arith.constant 0 : index
    %18 = vector.load %arg7[%c0_14, %c0_15] : memref<1x128xf32, #tpu.memory_space<vmem>>, vector<1x128xf32>
    %19 = arith.truncf %16 : vector<128x128xf32> to vector<128x128xbf16>
    %cst_16 = arith.constant dense<0.000000e+00> : vector<128x128xf32>
    %20 = tpu.matmul %19, %17, %cst_16 {dimension_numbers = #tpu.dot_dimension_numbers<[1], [0], [0], [1], [0, 0, 1, 1], [], []>} : vector<128x128xbf16>, vector<128x128xbf16>, vector<128x128xf32> -> vector<128x128xf32>
    %21 = vector.broadcast %18 : vector<1x128xf32> to vector<128x128xf32>
    %22 = arith.addf %20, %21 : vector<128x128xf32>
    %cst_17 = arith.constant 0.000000e+00 : f32
    %23 = vector.broadcast %cst_17 : f32 to vector<128x128xf32>
    %24 = arith.subf %23, %22 : vector<128x128xf32>
    %25 = math.exp %24 : vector<128x128xf32>
    %cst_18 = arith.constant 1.000000e+00 : f32
    %26 = vector.broadcast %cst_18 : f32 to vector<128x128xf32>
    %27 = arith.addf %26, %25 : vector<128x128xf32>
    %cst_19 = arith.constant 1.000000e+00 : f32
    %28 = vector.broadcast %cst_19 : f32 to vector<128x128xf32>
    %29 = arith.divf %28, %27 : vector<128x128xf32>
    %c0_20 = arith.constant 0 : index
    %c0_21 = arith.constant 0 : index
    %30 = vector.load %arg8[%c0_20, %c0_21] : memref<128x128xf32, #tpu.memory_space<vmem>>, vector<128x128xf32>
    tpu.vector_store %arg8[%c0_20, %c0_21], %29 {strides = array<i32>} : memref<128x128xf32, #tpu.memory_space<vmem>>, vector<128x128xf32>,
    return
  }
  func.func @transform_0(%arg0: i32) -> (i32, i32) {
    %c0_i32 = arith.constant 0 : i32
    %c0_i32_0 = arith.constant 0 : i32
    return %arg0, %c0_i32 : i32, i32
  }
  func.func @transform_1(%arg0: i32) -> (i32, i32) {
    %c0_i32 = arith.constant 0 : i32
    %c0_i32_0 = arith.constant 0 : i32
    %c0_i32_1 = arith.constant 0 : i32
    return %c0_i32, %c0_i32_0 : i32, i32
  }
  func.func @transform_2(%arg0: i32) -> (i32, i32) {
    %c0_i32 = arith.constant 0 : i32
    %c0_i32_0 = arith.constant 0 : i32
    %c0_i32_1 = arith.constant 0 : i32
    return %c0_i32, %c0_i32_0 : i32, i32
  }
  func.func @transform_3(%arg0: i32) -> (i32, i32) {
    %c0_i32 = arith.constant 0 : i32
    %c0_i32_0 = arith.constant 0 : i32
    %c0_i32_1 = arith.constant 0 : i32
    return %c0_i32, %c0_i32_0 : i32, i32
  }
  func.func @transform_4(%arg0: i32) -> (i32, i32) {
    %c0_i32 = arith.constant 0 : i32
    %c0_i32_0 = arith.constant 0 : i32
    %c0_i32_1 = arith.constant 0 : i32
    return %c0_i32, %c0_i32_0 : i32, i32
  }
  func.func @transform_5(%arg0: i32) -> (i32, i32) {
    %c0_i32 = arith.constant 0 : i32
    %c0_i32_0 = arith.constant 0 : i32
    %c0_i32_1 = arith.constant 0 : i32
    return %c0_i32, %c0_i32_0 : i32, i32
  }
  func.func @transform_6(%arg0: i32) -> (i32, i32) {
    %c0_i32 = arith.constant 0 : i32
    %c0_i32_0 = arith.constant 0 : i32
    %c0_i32_1 = arith.constant 0 : i32
    return %c0_i32, %c0_i32_0 : i32, i32
  }
  func.func @transform_7(%arg0: i32) -> (i32, i32) {
    %c0_i32 = arith.constant 0 : i32
    %c0_i32_0 = arith.constant 0 : i32
    return %arg0, %c0_i32 : i32, i32
  }
}

</mosaic_0001>

<bundles_post_ra>
// kernel: tpu_custom_call.1
= control target key start
LH: loop header
LB: loop body
LE: loop exit
PB: predicated region body
PF: predicated region fallthrough
CT: control target
= control target key end

     0   :  { %12 = vsyncpa [#allocation3], 0  ;;  %s1628_s0 = inlined_call_operand.vmem [shape: f32[256,8], index: 0, kind: input, shape index: {}]   ;;  %s1629_s1 = inlined_call_operand.vmem [shape: bf16[8,128], index: 1, kind: input, shape index: {}]   ;;  %s1630_s2 = inlined_call_operand.vmem [shape: f32[1,128], index: 2, kind: input, shape index: {}]   ;;  %s1631_s3 = inlined_call_operand.vmem [shape: bf16[128,128], index: 3, kind: input, shape index: {}]   ;;  %s1632_s4 = inlined_call_operand.vmem [shape: f32[1,128], index: 4, kind: input, shape index: {}]   ;;  %s1633_s5 = inlined_call_operand.vmem [shape: bf16[128,128], index: 5, kind: input, shape index: {}]   ;;  %s1634_s6 = inlined_call_operand.vmem [shape: f32[1,128], index: 6, kind: input, shape index: {}]   ;;  %s1635_s7 = inlined_call_operand.hbm [shape: f32[256,128], index: 7, kind: output, shape index: {}]  }
   0x1   :  { %14 = vsyncpa [#allocation3 + $0x1], 0  ;;  %s1399_s24 = smov 0   ;;  %s1401_s25 = smov 0  }
   0x2   :  { %s1403_s26 = smov 0   ;;  %s1405_s27 = smov 0  }
   0x3 LB: > { %s1420_s28 = sadd.s32 4294967295, %s1355_s27   ;;  %s1068_s29 = sadd.s32 4294967294, %s1355_s27   ;;  %s1355_s27 = sphi %s1405_s27, %s1641_s27   ;;  %s1351_s26 = sphi %s1403_s26, %s1640_s26   ;;  %s1347_s25 = sphi %s1401_s25, %s1639_s25   ;;  %s1343_s24 = sphi %s1399_s24, %s1638_s24  }
   0x4   : > { %s1424_s30 = sadd.s32 1, %s1355_s27   ;;  %s179_s8 = sadd.s32 1, %s1351_s26 }
   0x5   : > { %s176_s9 = ssub.s32 %s1355_s27, %s1424_s30  ;;  %p189_p0 = scmp.ne.s32.totalorder %s1351_s26, %s1347_s25 }
   0x6   : > { %p177_p1 = scmp.eq.s32.totalorder %s176_s9, 0  ;;  %p190_p2 = scmp.eq.s32.totalorder %s1420_s28, 1 }
   0x7   : > { %p195_p3 = scmp.ne.s32.totalorder %s1347_s25, %s1343_s24  ;;  %p196_p4 = scmp.eq.s32.totalorder %s1068_s29, 1 }
   0x8   : > { %s1435_s10 = scalar_select %p177_p1, %s1351_s26, %s179_s8  }
   0x9   : > { %p1437_p5 = por %p190_p2, %p189_p0  ;;  %p1441_p6 = por %p196_p4, %p195_p3 }
   0xa   : > { %p1071_p7 = scmp.ge.s32.totalorder %s1355_s27, 1  ;;  %p241_p8 = scmp.lt.s32.totalorder %s1355_s27, 3 }
   0xc   : > { %p242_p9 = pnand %p1071_p7, %p241_p8 }
   0xd   : > { %s1073_s15 = sshll.u32 (!%p242_p9), %s1420_s28, 4  ;;  %s1168_s20 = sshll.u32 (!%p242_p9), %s1420_s28, 7 }
   0xe   : > { %245 = sbr.rel (%p242_p9) target bundleno = 599 (0x257), region = 48  ;;  %p274_p10 = scmp.lt.s32.totalorder (!%p242_p9), %s1073_s15, 31 }
   0xf   : > { %s1002_s23 = scalar_lea.hbm (!%p242_p9), %s1635_s7, %s1168_s20 }
  0x10   : > { %s1005_s29 = sshll.u32 (!%p242_p9), %s1002_s23, 4  ;;  %s1006_s29 = int_to_ptr.hbm [resolvable:$true] %s1005_s29 }
  0x11   : > { %s1307_s8 = sshra.s32 (!%p242_p9), %s1006_s29, 4  ;;  %s1308_s8 = int_to_ptr.hbm [resolvable:$true] %s1307_s8 }
  0x12   : > { %s1309_s9 = scalar_lea.hbm (!%p242_p9), %s1308_s8, 128  ;;  %p1314_p0 = scmp.lt.s32.totalorder (!%p242_p9), %s1308_s8, %s1635_s7 }
  0x13   : > { %v297_v0 = vld [vmem:[%s1629_s1] sm:$0xf]  ;;  %vm335_vm0 = vcmask 1043456   ;;  %s1643_s15 = smov (!%p274_p10, %s1073_s15), 31  ;;  %vm310_vm1 = vcmask 64512   ;;  %v1159_v17 = vld [vmem:[%s1631_s3 + $0x38] sm:$0xff]  ;;  %p1310_p11 = scmp.ne.s32.totalorder %s1308_s8, %s1309_s9 }
  0x14   : > { %v337_v1 = vsel %vm335_vm0, %v297_v0, 0  ;;  %s1074_s16 = sshll.u32 %s1643_s15, 3  ;;  %480 = vmatpush.bf16.msra.mxu1 %v1159_v17  ;;  %1169 = vmatpush.bf16.msra.mxu3 %v1159_v17  ;;  %v1158_v21 = vld [vmem:[%s1631_s3 + $0x30] sm:$0xff]  ;;  %v1157_v22 = vld [vmem:[%s1631_s3 + $0x28] sm:$0xff]  ;;  %v1156_v23 = vld [vmem:[%s1631_s3 + $0x20] sm:$0xff]  ;;  %s1313_s15 = scalar_lea.hbm %s1635_s7, 256 }
  0x15   : > { %346 = vmatpush.bf16.msra.mxu0 %v337_v1  ;;  %s1454_s19 = scalar_lea.vmem %s1628_s0, %s1074_s16  ;;  %v1155_v26 = vld [vmem:[%s1631_s3 + $0x18] sm:$0xff]  ;;  %v1154_v28 = vld [vmem:[%s1631_s3 + $0x10] sm:$0xff]  ;;  %v1153_v29 = vld [vmem:[%s1631_s3 + $0x8] sm:$0xff]  ;;  %s270_s16 = sand.u32 1, %s1347_s25  }
  0x16   : > { %v281_v2 = vld [vmem:[%s1454_s19] sm:$0xff]  ;;  %v282_v3 = vld [vmem:[%s1454_s19 + $0x8] sm:$0xff]  ;;  %v283_v5 = vld [vmem:[%s1454_s19 + $0x10] sm:$0xff]  ;;  %s1072_s17 = sshll.u32 %s270_s16, 7  ;;  %p1311_p12 = pnand %p1310_p11, %p1437_p5 }
  0x17   : > { %v299_v4 = vpack.c.bf16 %v282_v3, %v281_v2  ;;  %v284_v6 = vld [vmem:[%s1454_s19 + $0x18] sm:$0xff]  ;;  %v285_v8 = vld [vmem:[%s1454_s19 + $0x20] sm:$0xff]  ;;  %v286_v9 = vld [vmem:[%s1454_s19 + $0x28] sm:$0xff]  ;;  %s1564_s18 = scalar_lea.vmem [#allocation2], %s1072_s17  ;;  %p1315_p1 = scmp.lt.s32.totalorder %s1313_s15, %s1309_s9 }
  0x18   : > { %v300_v7 = vpack.c.bf16 %v284_v6, %v283_v5  ;;  %v301_v10 = vpack.c.bf16 %v286_v9, %v285_v8  ;;  %v287_v11 = vld [vmem:[%s1454_s19 + $0x30] sm:$0xff]  ;;  %v288_v12 = vld [vmem:[%s1454_s19 + $0x38] sm:$0xff]  ;;  %v289_v14 = vld [vmem:[%s1454_s19 + $0x40] sm:$0xff]  ;;  %481 = vmatpush.bf16.msra.mxu1 %v1158_v21  ;;  %1170 = vmatpush.bf16.msra.mxu3 %v1158_v21  ;;  %s1003_s28 = sshll.u32 %s1564_s18, 4  ;;  %p1312_p13 = pneg %p1311_p12  ;;  %s1004_s28 = int_to_ptr.vmem [resolvable:$true] %s1003_s28 }
  0x19   : > { %1075 = vmatmul.msk.bf16.vlgmr.msra.gmra.mxu0 %vm310_vm1, %v299_v4  ;;  %v302_v13 = vpack.c.bf16 %v288_v12, %v287_v11  ;;  %v290_v15 = vld [vmem:[%s1454_s19 + $0x48] sm:$0xff]  ;;  %v291_v18 = vld [vmem:[%s1454_s19 + $0x50] sm:$0xff]  ;;  %v292_v19 = vld [vmem:[%s1454_s19 + $0x58] sm:$0xff]  ;;  %p1316_p2 = por %p1315_p1, %p1314_p0 }
  0x1a   : > { %v303_v16 = vpack.c.bf16 %v290_v15, %v289_v14  ;;  %v304_v20 = vpack.c.bf16 %v292_v19, %v291_v18  ;;  %v293_v24 = vld [vmem:[%s1454_s19 + $0x60] sm:$0xff]  ;;  %v294_v25 = vld [vmem:[%s1454_s19 + $0x68] sm:$0xff]  ;;  %v295_v31 = vld [vmem:[%s1454_s19 + $0x70] sm:$0xff] }
  0x1b   : > { %v305_v27 = vpack.c.bf16 %v294_v25, %v293_v24  ;;  %v1152_v30 = vld [vmem:[%s1631_s3] sm:$0xff]  ;;  %v296_v32 = vld [vmem:[%s1454_s19 + $0x78] sm:$0xff]  ;;  %v1166_v14 = vld [vmem:[%s1633_s5 + $0x30] sm:$0xff]  ;;  %s991_s19 = scalar_lea.sflag [#allocation3], %s270_s16  ;;  %p1317_p3 = pnand %p1316_p2, %p1312_p13 }
  0x1c   : > { %482 = vmatpush.bf16.msra.mxu1 %v1157_v22  ;;  %1171 = vmatpush.bf16.msra.mxu3 %v1157_v22  ;;  %v306_v33 = vpack.c.bf16 %v296_v32, %v295_v31  ;;  %v1507_v35 = vld [vmem:[%s1630_s2] ss:$0 sm:$0xff]  ;;  %v1163_v21 = vld [vmem:[%s1633_s5 + $0x18] sm:$0xff]  ;;  %v1162_v25 = vld [vmem:[%s1633_s5 + $0x10] sm:$0xff] }
  0x1d   : > { %v1164_v17 = vld [vmem:[%s1633_s5 + $0x20] sm:$0xff] }
  0x20   : > { %483 = vmatpush.bf16.msra.mxu1 %v1156_v23  ;;  %1172 = vmatpush.bf16.msra.mxu3 %v1156_v23 }
  0x24   : > { %484 = vmatpush.bf16.msra.mxu1 %v1155_v26  ;;  %1173 = vmatpush.bf16.msra.mxu3 %v1155_v26 }
  0x28   : > { %485 = vmatpush.bf16.msra.mxu1 %v1154_v28  ;;  %1174 = vmatpush.bf16.msra.mxu3 %v1154_v28  ;;  %v1160_v28 = vld [vmem:[%s1633_s5] sm:$0xff] }
  0x29   : > { %1076 = vmatmul.msk.bf16.gmra.mxu0 %vm310_vm1, %v300_v7 }
  0x2c   : > { %486 = vmatpush.bf16.msra.mxu1 %v1153_v29  ;;  %1175 = vmatpush.bf16.msra.mxu3 %v1153_v29 }
  0x30   : > { %487 = vmatpush.bf16.msra.mxu1 %v1152_v30  ;;  %1176 = vmatpush.bf16.msra.mxu3 %v1152_v30 }
  0x39   : > { %1077 = vmatmul.msk.bf16.gmra.mxu0 %vm310_vm1, %v301_v10  ;;  %v1167_v10 = vld [vmem:[%s1633_s5 + $0x38] sm:$0xff] }
  0x3a   : > { %621 = vmatpush.bf16.msra.mxu2 %v1167_v10  ;;  %1177 = vmatpush.bf16.msrb.mxu3 %v1167_v10 }
  0x3e   : > { %622 = vmatpush.bf16.msra.mxu2 %v1166_v14  ;;  %1178 = vmatpush.bf16.msrb.mxu3 %v1166_v14 }
  0x49   : > { %1078 = vmatmul.msk.bf16.gmra.mxu0 %vm310_vm1, %v302_v13 }
  0x59   : > { %1079 = vmatmul.msk.bf16.gmra.mxu0 %vm310_vm1, %v303_v16  ;;  %v1165_v16 = vld [vmem:[%s1633_s5 + $0x28] sm:$0xff] }
  0x5a   : > { %623 = vmatpush.bf16.msra.mxu2 %v1165_v16  ;;  %1179 = vmatpush.bf16.msrb.mxu3 %v1165_v16 }
  0x5e   : > { %624 = vmatpush.bf16.msra.mxu2 %v1164_v17  ;;  %1180 = vmatpush.bf16.msrb.mxu3 %v1164_v17 }
  0x62   : > { %625 = vmatpush.bf16.msra.mxu2 %v1163_v21  ;;  %1181 = vmatpush.bf16.msrb.mxu3 %v1163_v21 }
  0x66   : > { %626 = vmatpush.bf16.msra.mxu2 %v1162_v25  ;;  %1182 = vmatpush.bf16.msrb.mxu3 %v1162_v25 }
  0x69   : > { %1080 = vmatmul.msk.bf16.gmra.mxu0 %vm310_vm1, %v304_v20 }
  0x79   : > { %1081 = vmatmul.msk.bf16.gmra.mxu0 %vm310_vm1, %v305_v27  ;;  %v1161_v27 = vld [vmem:[%s1633_s5 + $0x8] sm:$0xff] }
  0x7a   : > { %627 = vmatpush.bf16.msra.mxu2 %v1161_v27  ;;  %1183 = vmatpush.bf16.msrb.mxu3 %v1161_v27 }
  0x7e   : > { %628 = vmatpush.bf16.msra.mxu2 %v1160_v28  ;;  %1184 = vmatpush.bf16.msrb.mxu3 %v1160_v28  ;;  %v1555_v28 = vld [vmem:[%s1634_s6] ss:$0 sm:$0xff] }
  0x89   : > { %1082 = vmatmul.msk.bf16.gmra.mxu0 %vm310_vm1, %v306_v33 }
  0x96   : > { %v348_v34 = vpop.f32.mrf.mxu0 }
  0x97   : > { %v349_v36 = vadd.f32 %v1507_v35, %v348_v34 }
  0x99   : > { %v388_v39 = vmax.f32 %v349_v36, 0.0 }
  0x9e   : > { %v350_v37 = vpop.f32.mrf.mxu0 }
  0x9f   : > { %v351_v38 = vadd.f32 %v1507_v35, %v350_v37  ;;  %v1227_v37 = vld [vmem:[%s1632_s4] ss:$0 sm:$0xff] }
  0xa1   : > { %v389_v40 = vmax.f32 %v351_v38, 0.0 }
  0xa3   : > { %v421_v41 = vpack.c.bf16 %v389_v40, %v388_v39 }
  0xa5   : > { %488 = vmatmul.bf16.vlgmr.msra.gmra.mxu1 %v421_v41 }
  0xa6   : > { %v353_v42 = vpop.f32.mrf.mxu0 }
  0xa7   : > { %v354_v43 = vadd.f32 %v1507_v35, %v353_v42 }
  0xa9   : > { %v390_v46 = vmax.f32 %v354_v43, 0.0 }
  0xae   : > { %v355_v44 = vpop.f32.mrf.mxu0 }
  0xaf   : > { %v356_v45 = vadd.f32 %v1507_v35, %v355_v44 }
  0xb1   : > { %v391_v47 = vmax.f32 %v356_v45, 0.0 }
  0xb3   : > { %v422_v48 = vpack.c.bf16 %v391_v47, %v390_v46 }
  0xb5   : > { %493 = vmatmul.bf16.gmra.mxu1 %v422_v48 }
  0xb6   : > { %v358_v49 = vpop.f32.mrf.mxu0 }
  0xb7   : > { %v359_v50 = vadd.f32 %v1507_v35, %v358_v49 }
  0xb9   : > { %v392_v53 = vmax.f32 %v359_v50, 0.0 }
  0xbe   : > { %v360_v51 = vpop.f32.mrf.mxu0 }
  0xbf   : > { %v361_v52 = vadd.f32 %v1507_v35, %v360_v51 }
  0xc1   : > { %v393_v54 = vmax.f32 %v361_v52, 0.0 }
  0xc3   : > { %v423_v55 = vpack.c.bf16 %v393_v54, %v392_v53 }
  0xc5   : > { %498 = vmatmul.bf16.gmra.mxu1 %v423_v55 }
  0xc6   : > { %v363_v56 = vpop.f32.mrf.mxu0 }
  0xc7   : > { %v364_v57 = vadd.f32 %v1507_v35, %v363_v56 }
  0xc9   : > { %v394_v60 = vmax.f32 %v364_v57, 0.0 }
  0xce   : > { %v365_v58 = vpop.f32.mrf.mxu0 }
  0xcf   : > { %v366_v59 = vadd.f32 %v1507_v35, %v365_v58 }
  0xd1   : > { %v395_v61 = vmax.f32 %v366_v59, 0.0 }
  0xd3   : > { %v424_v62 = vpack.c.bf16 %v395_v61, %v394_v60 }
  0xd5   : > { %503 = vmatmul.bf16.gmra.mxu1 %v424_v62 }
  0xd6   : > { %v368_v63 = vpop.f32.mrf.mxu0 }
  0xd7   : > { %v369_v0 = vadd.f32 %v1507_v35, %v368_v63 }
  0xd9   : > { %v396_v3 = vmax.f32 %v369_v0, 0.0 }
  0xde   : > { %v370_v1 = vpop.f32.mrf.mxu0 }
  0xdf   : > { %v371_v2 = vadd.f32 %v1507_v35, %v370_v1 }
  0xe1   : > { %v397_v4 = vmax.f32 %v371_v2, 0.0 }
  0xe3   : > { %v425_v5 = vpack.c.bf16 %v397_v4, %v396_v3 }
  0xe5   : > { %508 = vmatmul.bf16.gmra.mxu1 %v425_v5 }
  0xe6   : > { %v373_v6 = vpop.f32.mrf.mxu0 }
  0xe7   : > { %v374_v7 = vadd.f32 %v1507_v35, %v373_v6 }
  0xe9   : > { %v398_v11 = vmax.f32 %v374_v7, 0.0 }
  0xee   : > { %v375_v8 = vpop.f32.mrf.mxu0 }
  0xef   : > { %v376_v9 = vadd.f32 %v1507_v35, %v375_v8 }
  0xf1   : > { %v399_v12 = vmax.f32 %v376_v9, 0.0 }
  0xf3   : > { %v426_v13 = vpack.c.bf16 %v399_v12, %v398_v11 }
  0xf5   : > { %513 = vmatmul.bf16.gmra.mxu1 %v426_v13 }
  0xf6   : > { %v378_v15 = vpop.f32.mrf.mxu0 }
  0xf7   : > { %v379_v18 = vadd.f32 %v1507_v35, %v378_v15 }
  0xf9   : > { %v400_v22 = vmax.f32 %v379_v18, 0.0 }
  0xfe   : > { %v380_v19 = vpop.f32.mrf.mxu0 }
  0xff   : > { %v381_v20 = vadd.f32 %v1507_v35, %v380_v19 }
 0x101   : > { %v401_v23 = vmax.f32 %v381_v20, 0.0 }
 0x103   : > { %v427_v24 = vpack.c.bf16 %v401_v23, %v400_v22 }
 0x105   : > { %518 = vmatmul.bf16.vlgmr.msra.gmra.mxu3 %v427_v24 }
 0x106   : > { %v383_v26 = vpop.f32.mrf.mxu0 }
 0x107   : > { %v384_v29 = vadd.f32 %v1507_v35, %v383_v26 }
 0x109   : > { %v402_v32 = vmax.f32 %v384_v29, 0.0 }
 0x10e   : > { %v385_v30 = vpop.f32.mrf.mxu0 }
 0x10f   : > { %v386_v31 = vadd.f32 %v1507_v35, %v385_v30 }
 0x111   : > { %v403_v33 = vmax.f32 %v386_v31, 0.0 }
 0x113   : > { %v428_v34 = vpack.c.bf16 %v403_v33, %v402_v32 }
 0x115   : > { %523 = vmatmul.bf16.gmra.mxu3 %v428_v34 }
 0x122   : > { %v489_v36 = vpop.f32.mrf.mxu1 }
 0x123   : > { %v490_v38 = vadd.f32 %v1227_v37, %v489_v36 }
 0x125   : > { %v529_v41 = vmax.f32 %v490_v38, 0.0 }
 0x12a   : > { %v491_v39 = vpop.f32.mrf.mxu1 }
 0x12b   : > { %v492_v40 = vadd.f32 %v1227_v37, %v491_v39 }
 0x12d   : > { %v530_v42 = vmax.f32 %v492_v40, 0.0 }
 0x12f   : > { %v562_v43 = vpack.c.bf16 %v530_v42, %v529_v41 }
 0x131   : > { %629 = vmatmul.bf16.vlgmr.msra.gmra.mxu2 %v562_v43 }
 0x132   : > { %v494_v44 = vpop.f32.mrf.mxu1 }
 0x133   : > { %v495_v45 = vadd.f32 %v1227_v37, %v494_v44 }
 0x135   : > { %v531_v47 = vmax.f32 %v495_v45, 0.0 }
 0x13a   : > { %v496_v46 = vpop.f32.mrf.mxu1 }
 0x13b   : > { %v497_v35 = vadd.f32 %v1227_v37, %v496_v46 }
 0x13d   : > { %v532_v48 = vmax.f32 %v497_v35, 0.0 }
 0x13f   : > { %v563_v49 = vpack.c.bf16 %v532_v48, %v531_v47 }
 0x141   : > { %634 = vmatmul.bf16.gmra.mxu2 %v563_v49 }
 0x142   : > { %v499_v50 = vpop.f32.mrf.mxu1 }
 0x143   : > { %v500_v51 = vadd.f32 %v1227_v37, %v499_v50 }
 0x145   : > { %v533_v54 = vmax.f32 %v500_v51, 0.0 }
 0x14a   : > { %v501_v52 = vpop.f32.mrf.mxu1 }
 0x14b   : > { %v502_v53 = vadd.f32 %v1227_v37, %v501_v52 }
 0x14d   : > { %v534_v55 = vmax.f32 %v502_v53, 0.0 }
 0x14f   : > { %v564_v56 = vpack.c.bf16 %v534_v55, %v533_v54 }
 0x151   : > { %639 = vmatmul.bf16.gmra.mxu2 %v564_v56 }
 0x152   : > { %v504_v57 = vpop.f32.mrf.mxu1 }
 0x153   : > { %v505_v58 = vadd.f32 %v1227_v37, %v504_v57 }
 0x155   : > { %v535_v61 = vmax.f32 %v505_v58, 0.0 }
 0x15a   : > { %v506_v59 = vpop.f32.mrf.mxu1 }
 0x15b   : > { %v507_v60 = vadd.f32 %v1227_v37, %v506_v59 }
 0x15d   : > { %v536_v62 = vmax.f32 %v507_v60, 0.0 }
 0x15f   : > { %v565_v63 = vpack.c.bf16 %v536_v62, %v535_v61 }
 0x161   : > { %644 = vmatmul.bf16.gmra.mxu2 %v565_v63 }
 0x162   : > { %v509_v0 = vpop.f32.mrf.mxu1 }
 0x163   : > { %v510_v1 = vadd.f32 %v1227_v37, %v509_v0 }
 0x165   : > { %v537_v4 = vmax.f32 %v510_v1, 0.0 }
 0x16a   : > { %v511_v2 = vpop.f32.mrf.mxu1 }
 0x16b   : > { %v512_v3 = vadd.f32 %v1227_v37, %v511_v2 }
 0x16d   : > { %v538_v5 = vmax.f32 %v512_v3, 0.0 }
 0x16f   : > { %v566_v6 = vpack.c.bf16 %v538_v5, %v537_v4 }
 0x171   : > { %649 = vmatmul.bf16.gmra.mxu2 %v566_v6 }
 0x172   : > { %v514_v7 = vpop.f32.mrf.mxu1 }
 0x173   : > { %v515_v8 = vadd.f32 %v1227_v37, %v514_v7 }
 0x175   : > { %v539_v11 = vmax.f32 %v515_v8, 0.0 }
 0x17a   : > { %v516_v9 = vpop.f32.mrf.mxu1 }
 0x17b   : > { %v517_v10 = vadd.f32 %v1227_v37, %v516_v9 }
 0x17d   : > { %v540_v12 = vmax.f32 %v517_v10, 0.0 }
 0x17f   : > { %v567_v13 = vpack.c.bf16 %v540_v12, %v539_v11 }
 0x181   : > { %654 = vmatmul.bf16.gmra.mxu2 %v567_v13 }
 0x188   : > { %v519_v14 = vpop.f32.mrf.mxu3 }
 0x189   : > { %v520_v15 = vadd.f32 %v1227_v37, %v519_v14 }
 0x18b   : > { %v541_v18 = vmax.f32 %v520_v15, 0.0 }
 0x190   : > { %v521_v16 = vpop.f32.mrf.mxu3 }
 0x191   : > { %v522_v17 = vadd.f32 %v1227_v37, %v521_v16 }
 0x193   : > { %v542_v19 = vmax.f32 %v522_v17, 0.0 }
 0x195   : > { %v568_v20 = vpack.c.bf16 %v542_v19, %v541_v18 }
 0x197   : > { %659 = vmatmul.bf16.vlgmr.msrb.gmra.mxu3 %v568_v20 }
 0x198   : > { %v524_v21 = vpop.f32.mrf.mxu3 }
 0x199   : > { %v525_v22 = vadd.f32 %v1227_v37, %v524_v21 }
 0x19b   : > { %v543_v25 = vmax.f32 %v525_v22, 0.0 }
 0x1a0   : > { %v526_v23 = vpop.f32.mrf.mxu3 }
 0x1a1   : > { %v527_v24 = vadd.f32 %v1227_v37, %v526_v23 }
 0x1a3   : > { %v544_v26 = vmax.f32 %v527_v24, 0.0 }
 0x1a5   : > { %v569_v27 = vpack.c.bf16 %v544_v26, %v543_v25 }
 0x1a7   : > { %664 = vmatmul.bf16.gmra.mxu3 %v569_v27 }
 0x1b4   : > { %v630_v29 = vpop.f32.mrf.mxu2 }
 0x1b5   : > { %v631_v30 = vadd.f32 %v1555_v28, %v630_v29 }
 0x1b7   : > { %v670_v31 = vsub.f32 0.0, %v631_v30 }
 0x1b9   : > { %v686_v32 = vmul.f32 1.442695, %v670_v31 }
 0x1bb   : > { %1229 = vpow2.f32 %v686_v32 }
 0x1bc   : > { %v632_v33 = vpop.f32.mrf.mxu2 }
 0x1bd   : > { %v633_v34 = vadd.f32 %v1555_v28, %v632_v33 }
 0x1bf   : > { %v671_v36 = vsub.f32 0.0, %v633_v34 }
 0x1c1   : > { %v1230_v37 = vpop.eup %1229  ;;  %v688_v38 = vmul.f32 1.442695, %v671_v36 }
 0x1c2   : > { %v718_v39 = vadd.f32 1.0, %v1230_v37 }
 0x1c3   : > { %1231 = vpow2.f32 %v688_v38 }
 0x1c4   : > { %1233 = vrcp.f32 %v718_v39  ;;  %v635_v40 = vpop.f32.mrf.mxu2  ;;  %v745_v50 = vand.u32 2147483648, %v718_v39  ;;  %v743_v52 = vand.u32 2147483647, %v718_v39  ;;  %vm739_vm3 = vweird.f32 %v718_v39 }
 0x1c5   : > { %v636_v41 = vadd.f32 %v1555_v28, %v635_v40 }
 0x1c6   : > { %v746_v58 = vor.u32 1.1754944e-38, %v745_v50  ;;  %vm744_vm5 = vcmp.eq.f32.partialorder %v743_v52, 8.507059e+37 }
 0x1c7   : > { %v672_v42 = vsub.f32 0.0, %v636_v41 }
 0x1c9   : > { %v1232_v43 = vpop.eup %1231  ;;  %v690_v44 = vmul.f32 1.442695, %v672_v42 }
 0x1ca   : > { %v1234_v45 = vpop.eup %1233  ;;  %v719_v46 = vadd.f32 1.0, %v1232_v43 }
 0x1cb   : > { %v735_v35 = vmul.f32 %v1234_v45, %v718_v39  ;;  %1235 = vpow2.f32 %v690_v44  ;;  %vm740_vm2 = vweird.f32 %v1234_v45 }
 0x1cc   : > { %1237 = vrcp.f32 %v719_v46  ;;  %v637_v47 = vpop.f32.mrf.mxu2  ;;  %vm741_vm4 = vmor %vm739_vm3, %vm740_vm2  ;;  %v760_v2 = vand.u32 2147483648, %v719_v46  ;;  %v758_v4 = vand.u32 2147483647, %v719_v46  ;;  %vm754_vm7 = vweird.f32 %v719_v46 }
 0x1cd   : > { %v736_v48 = vsub.f32 1.0, %v735_v35  ;;  %v638_v49 = vadd.f32 %v1555_v28, %v637_v47 }
 0x1ce   : > { %v761_v10 = vor.u32 1.1754944e-38, %v760_v2  ;;  %vm759_vm9 = vcmp.eq.f32.partialorder %v758_v4, 8.507059e+37 }
 0x1cf   : > { %v737_v51 = vmul.f32 %v1234_v45, %v736_v48  ;;  %v673_v53 = vsub.f32 0.0, %v638_v49 }
 0x1d1   : > { %v1236_v54 = vpop.eup %1235  ;;  %v738_v55 = vadd.f32 %v1234_v45, %v737_v51  ;;  %v692_v56 = vmul.f32 1.442695, %v673_v53 }
 0x1d2   : > { %v1238_v57 = vpop.eup %1237  ;;  %v720_v59 = vadd.f32 1.0, %v1236_v54 }
 0x1d3   : > { %v742_v60 = vsel %vm741_vm4, %v1234_v45, %v738_v55  ;;  %v750_v61 = vmul.f32 %v1238_v57, %v719_v46  ;;  %1239 = vpow2.f32 %v692_v56  ;;  %vm755_vm6 = vweird.f32 %v1238_v57 }
 0x1d4   : > { %v747_v62 = vsel %vm744_vm5, %v746_v58, %v742_v60  ;;  %1241 = vrcp.f32 %v720_v59  ;;  %v640_v63 = vpop.f32.mrf.mxu2  ;;  %vm756_vm8 = vmor %vm754_vm7, %vm755_vm6  ;;  %v775_v18 = vand.u32 2147483648, %v720_v59  ;;  %v773_v20 = vand.u32 2147483647, %v720_v59 }
 0x1d5   : > { %974 = vst [vmem:[%s1564_s18] sm:$0xff] %v747_v62  ;;  %v751_v0 = vsub.f32 1.0, %v750_v61  ;;  %v641_v1 = vadd.f32 %v1555_v28, %v640_v63  ;;  %vm769_vm11 = vweird.f32 %v720_v59 }
 0x1d6   : > { %v776_v26 = vor.u32 1.1754944e-38, %v775_v18  ;;  %vm774_vm13 = vcmp.eq.f32.partialorder %v773_v20, 8.507059e+37 }
 0x1d7   : > { %v752_v3 = vmul.f32 %v1238_v57, %v751_v0  ;;  %v674_v5 = vsub.f32 0.0, %v641_v1 }
 0x1d9   : > { %v1240_v6 = vpop.eup %1239  ;;  %v753_v7 = vadd.f32 %v1238_v57, %v752_v3  ;;  %v694_v8 = vmul.f32 1.442695, %v674_v5 }
 0x1da   : > { %v1242_v9 = vpop.eup %1241  ;;  %v721_v11 = vadd.f32 1.0, %v1240_v6 }
 0x1db   : > { %v757_v12 = vsel %vm756_vm8, %v1238_v57, %v753_v7  ;;  %v765_v13 = vmul.f32 %v1242_v9, %v720_v59  ;;  %1243 = vpow2.f32 %v694_v8  ;;  %vm770_vm10 = vweird.f32 %v1242_v9 }
 0x1dc   : > { %v762_v14 = vsel %vm759_vm9, %v761_v10, %v757_v12  ;;  %1245 = vrcp.f32 %v721_v11  ;;  %v642_v15 = vpop.f32.mrf.mxu2  ;;  %vm771_vm12 = vmor %vm769_vm11, %vm770_vm10  ;;  %v790_v36 = vand.u32 2147483648, %v721_v11  ;;  %v788_v38 = vand.u32 2147483647, %v721_v11 }
 0x1dd   : > { %975 = vst [vmem:[%s1564_s18 + $0x8] sm:$0xff] %v762_v14  ;;  %v766_v16 = vsub.f32 1.0, %v765_v13  ;;  %v643_v17 = vadd.f32 %v1555_v28, %v642_v15  ;;  %vm784_vm15 = vweird.f32 %v721_v11 }
 0x1de   : > { %v791_v44 = vor.u32 1.1754944e-38, %v790_v36  ;;  %vm789_vm1 = vcmp.eq.f32.partialorder %v788_v38, 8.507059e+37 }
 0x1df   : > { %v767_v19 = vmul.f32 %v1242_v9, %v766_v16  ;;  %v675_v21 = vsub.f32 0.0, %v643_v17 }
 0x1e1   : > { %v1244_v22 = vpop.eup %1243  ;;  %v768_v23 = vadd.f32 %v1242_v9, %v767_v19  ;;  %v696_v24 = vmul.f32 1.442695, %v675_v21 }
 0x1e2   : > { %v1246_v25 = vpop.eup %1245  ;;  %v722_v27 = vadd.f32 1.0, %v1244_v22 }
 0x1e3   : > { %v772_v29 = vsel %vm771_vm12, %v1242_v9, %v768_v23  ;;  %v780_v30 = vmul.f32 %v1246_v25, %v721_v11  ;;  %1247 = vpow2.f32 %v696_v24  ;;  %vm785_vm14 = vweird.f32 %v1246_v25 }
 0x1e4   : > { %v777_v31 = vsel %vm774_vm13, %v776_v26, %v772_v29  ;;  %1249 = vrcp.f32 %v722_v27  ;;  %v645_v32 = vpop.f32.mrf.mxu2  ;;  %vm786_vm0 = vmor %vm784_vm15, %vm785_vm14  ;;  %v805_v51 = vand.u32 2147483648, %v722_v27  ;;  %v803_v53 = vand.u32 2147483647, %v722_v27 }
 0x1e5   : > { %976 = vst [vmem:[%s1564_s18 + $0x10] sm:$0xff] %v777_v31  ;;  %v781_v33 = vsub.f32 1.0, %v780_v30  ;;  %v646_v34 = vadd.f32 %v1555_v28, %v645_v32  ;;  %vm799_vm3 = vweird.f32 %v722_v27 }
 0x1e6   : > { %v806_v59 = vor.u32 1.1754944e-38, %v805_v51  ;;  %vm804_vm5 = vcmp.eq.f32.partialorder %v803_v53, 8.507059e+37 }
 0x1e7   : > { %v782_v37 = vmul.f32 %v1246_v25, %v781_v33  ;;  %v676_v39 = vsub.f32 0.0, %v646_v34 }
 0x1e9   : > { %v1248_v40 = vpop.eup %1247  ;;  %v783_v41 = vadd.f32 %v1246_v25, %v782_v37  ;;  %v698_v42 = vmul.f32 1.442695, %v676_v39 }
 0x1ea   : > { %v1250_v43 = vpop.eup %1249  ;;  %v723_v45 = vadd.f32 1.0, %v1248_v40 }
 0x1eb   : > { %v787_v46 = vsel %vm786_vm0, %v1246_v25, %v783_v41  ;;  %v795_v35 = vmul.f32 %v1250_v43, %v722_v27  ;;  %1251 = vpow2.f32 %v698_v42  ;;  %vm800_vm2 = vweird.f32 %v1250_v43 }
 0x1ec   : > { %v792_v47 = vsel %vm789_vm1, %v791_v44, %v787_v46  ;;  %1253 = vrcp.f32 %v723_v45  ;;  %v647_v48 = vpop.f32.mrf.mxu2  ;;  %vm801_vm4 = vmor %vm799_vm3, %vm800_vm2  ;;  %v820_v3 = vand.u32 2147483648, %v723_v45  ;;  %v818_v5 = vand.u32 2147483647, %v723_v45 }
 0x1ed   : > { %977 = vst [vmem:[%s1564_s18 + $0x18] sm:$0xff] %v792_v47  ;;  %v796_v49 = vsub.f32 1.0, %v795_v35  ;;  %v648_v50 = vadd.f32 %v1555_v28, %v647_v48  ;;  %vm814_vm7 = vweird.f32 %v723_v45 }
 0x1ee   : > { %v821_v11 = vor.u32 1.1754944e-38, %v820_v3  ;;  %vm819_vm9 = vcmp.eq.f32.partialorder %v818_v5, 8.507059e+37 }
 0x1ef   : > { %v797_v52 = vmul.f32 %v1250_v43, %v796_v49  ;;  %v677_v54 = vsub.f32 0.0, %v648_v50 }
 0x1f1   : > { %v1252_v55 = vpop.eup %1251  ;;  %v798_v56 = vadd.f32 %v1250_v43, %v797_v52  ;;  %v700_v57 = vmul.f32 1.442695, %v677_v54 }
 0x1f2   : > { %v1254_v58 = vpop.eup %1253  ;;  %v724_v60 = vadd.f32 1.0, %v1252_v55 }
 0x1f3   : > { %v802_v61 = vsel %vm801_vm4, %v1250_v43, %v798_v56  ;;  %v810_v62 = vmul.f32 %v1254_v58, %v723_v45  ;;  %1255 = vpow2.f32 %v700_v57  ;;  %vm815_vm6 = vweird.f32 %v1254_v58 }
 0x1f4   : > { %v807_v63 = vsel %vm804_vm5, %v806_v59, %v802_v61  ;;  %1257 = vrcp.f32 %v724_v60  ;;  %v650_v0 = vpop.f32.mrf.mxu2  ;;  %vm816_vm8 = vmor %vm814_vm7, %vm815_vm6  ;;  %v835_v19 = vand.u32 2147483648, %v724_v60  ;;  %v833_v21 = vand.u32 2147483647, %v724_v60 }
 0x1f5   : > { %978 = vst [vmem:[%s1564_s18 + $0x20] sm:$0xff] %v807_v63  ;;  %v811_v1 = vsub.f32 1.0, %v810_v62  ;;  %v651_v2 = vadd.f32 %v1555_v28, %v650_v0  ;;  %vm829_vm11 = vweird.f32 %v724_v60 }
 0x1f6   : > { %v836_v27 = vor.u32 1.1754944e-38, %v835_v19  ;;  %vm834_vm13 = vcmp.eq.f32.partialorder %v833_v21, 8.507059e+37 }
 0x1f7   : > { %v812_v4 = vmul.f32 %v1254_v58, %v811_v1  ;;  %v678_v6 = vsub.f32 0.0, %v651_v2 }
 0x1f9   : > { %v1256_v7 = vpop.eup %1255  ;;  %v813_v8 = vadd.f32 %v1254_v58, %v812_v4  ;;  %v702_v9 = vmul.f32 1.442695, %v678_v6 }
 0x1fa   : > { %v1258_v10 = vpop.eup %1257  ;;  %v725_v12 = vadd.f32 1.0, %v1256_v7 }
 0x1fb   : > { %v817_v13 = vsel %vm816_vm8, %v1254_v58, %v813_v8  ;;  %v825_v14 = vmul.f32 %v1258_v10, %v724_v60  ;;  %1259 = vpow2.f32 %v702_v9  ;;  %vm830_vm10 = vweird.f32 %v1258_v10 }
 0x1fc   : > { %v822_v15 = vsel %vm819_vm9, %v821_v11, %v817_v13  ;;  %1261 = vrcp.f32 %v725_v12  ;;  %v652_v16 = vpop.f32.mrf.mxu2  ;;  %vm831_vm12 = vmor %vm829_vm11, %vm830_vm10  ;;  %v850_v37 = vand.u32 2147483648, %v725_v12  ;;  %v848_v39 = vand.u32 2147483647, %v725_v12 }
 0x1fd   : > { %979 = vst [vmem:[%s1564_s18 + $0x28] sm:$0xff] %v822_v15  ;;  %v826_v17 = vsub.f32 1.0, %v825_v14  ;;  %v653_v18 = vadd.f32 %v1555_v28, %v652_v16  ;;  %vm844_vm15 = vweird.f32 %v725_v12 }
 0x1fe   : > { %v851_v45 = vor.u32 1.1754944e-38, %v850_v37  ;;  %vm849_vm1 = vcmp.eq.f32.partialorder %v848_v39, 8.507059e+37 }
 0x1ff   : > { %v827_v20 = vmul.f32 %v1258_v10, %v826_v17  ;;  %v679_v22 = vsub.f32 0.0, %v653_v18 }
 0x201   : > { %v1260_v23 = vpop.eup %1259  ;;  %v828_v24 = vadd.f32 %v1258_v10, %v827_v20  ;;  %v704_v25 = vmul.f32 1.442695, %v679_v22 }
 0x202   : > { %v1262_v26 = vpop.eup %1261  ;;  %v726_v29 = vadd.f32 1.0, %v1260_v23 }
 0x203   : > { %v832_v30 = vsel %vm831_vm12, %v1258_v10, %v828_v24  ;;  %v840_v31 = vmul.f32 %v1262_v26, %v725_v12  ;;  %1263 = vpow2.f32 %v704_v25  ;;  %vm845_vm14 = vweird.f32 %v1262_v26 }
 0x204   : > { %v837_v32 = vsel %vm834_vm13, %v836_v27, %v832_v30  ;;  %1265 = vrcp.f32 %v726_v29  ;;  %v655_v33 = vpop.f32.mrf.mxu2  ;;  %vm846_vm0 = vmor %vm844_vm15, %vm845_vm14  ;;  %v865_v52 = vand.u32 2147483648, %v726_v29  ;;  %v863_v54 = vand.u32 2147483647, %v726_v29 }
 0x205   : > { %980 = vst [vmem:[%s1564_s18 + $0x30] sm:$0xff] %v837_v32  ;;  %v841_v34 = vsub.f32 1.0, %v840_v31  ;;  %v656_v36 = vadd.f32 %v1555_v28, %v655_v33  ;;  %vm859_vm3 = vweird.f32 %v726_v29 }
 0x206   : > { %v866_v60 = vor.u32 1.1754944e-38, %v865_v52  ;;  %vm864_vm5 = vcmp.eq.f32.partialorder %v863_v54, 8.507059e+37 }
 0x207   : > { %v842_v38 = vmul.f32 %v1262_v26, %v841_v34  ;;  %v680_v40 = vsub.f32 0.0, %v656_v36 }
 0x209   : > { %v1264_v41 = vpop.eup %1263  ;;  %v843_v42 = vadd.f32 %v1262_v26, %v842_v38  ;;  %v706_v43 = vmul.f32 1.442695, %v680_v40 }
 0x20a   : > { %v1266_v44 = vpop.eup %1265  ;;  %v727_v46 = vadd.f32 1.0, %v1264_v41 }
 0x20b   : > { %v847_v35 = vsel %vm846_vm0, %v1262_v26, %v843_v42  ;;  %v855_v47 = vmul.f32 %v1266_v44, %v726_v29  ;;  %1267 = vpow2.f32 %v706_v43  ;;  %vm860_vm2 = vweird.f32 %v1266_v44 }
 0x20c   : > { %v852_v48 = vsel %vm849_vm1, %v851_v45, %v847_v35  ;;  %1269 = vrcp.f32 %v727_v46  ;;  %v657_v49 = vpop.f32.mrf.mxu2  ;;  %vm861_vm4 = vmor %vm859_vm3, %vm860_vm2  ;;  %v880_v2 = vand.u32 2147483648, %v727_v46  ;;  %v878_v4 = vand.u32 2147483647, %v727_v46 }
 0x20d   : > { %981 = vst [vmem:[%s1564_s18 + $0x38] sm:$0xff] %v852_v48  ;;  %v856_v50 = vsub.f32 1.0, %v855_v47  ;;  %v658_v51 = vadd.f32 %v1555_v28, %v657_v49  ;;  %vm874_vm7 = vweird.f32 %v727_v46 }
 0x20e   : > { %v881_v8 = vor.u32 1.1754944e-38, %v880_v2  ;;  %vm879_vm9 = vcmp.eq.f32.partialorder %v878_v4, 8.507059e+37 }
 0x20f   : > { %v857_v53 = vmul.f32 %v1266_v44, %v856_v50  ;;  %v681_v55 = vsub.f32 0.0, %v658_v51 }
 0x211   : > { %v1268_v56 = vpop.eup %1267  ;;  %v858_v57 = vadd.f32 %v1266_v44, %v857_v53  ;;  %v708_v58 = vmul.f32 1.442695, %v681_v55 }
 0x212   : > { %v1270_v59 = vpop.eup %1269  ;;  %v728_v61 = vadd.f32 1.0, %v1268_v56 }
 0x213   : > { %v862_v62 = vsel %vm861_vm4, %v1266_v44, %v858_v57  ;;  %v870_v63 = vmul.f32 %v1270_v59, %v727_v46  ;;  %1271 = vpow2.f32 %v708_v58  ;;  %vm875_vm6 = vweird.f32 %v1270_v59 }
 0x214   : > { %v867_v0 = vsel %vm864_vm5, %v866_v60, %v862_v62  ;;  %1273 = vrcp.f32 %v728_v61  ;;  %vm876_vm8 = vmor %vm874_vm7, %vm875_vm6  ;;  %v895_v17 = vand.u32 2147483648, %v728_v61  ;;  %v893_v19 = vand.u32 2147483647, %v728_v61 }
 0x215   : > { %982 = vst [vmem:[%s1564_s18 + $0x40] sm:$0xff] %v867_v0  ;;  %v871_v1 = vsub.f32 1.0, %v870_v63  ;;  %vm889_vm11 = vweird.f32 %v728_v61 }
 0x216   : > { %v896_v23 = vor.u32 1.1754944e-38, %v895_v17  ;;  %vm894_vm13 = vcmp.eq.f32.partialorder %v893_v19, 8.507059e+37 }
 0x217   : > { %v872_v3 = vmul.f32 %v1270_v59, %v871_v1 }
 0x219   : > { %v1272_v5 = vpop.eup %1271  ;;  %v873_v6 = vadd.f32 %v1270_v59, %v872_v3 }
 0x21a   : > { %v1274_v7 = vpop.eup %1273  ;;  %v729_v9 = vadd.f32 1.0, %v1272_v5  ;;  %v660_v10 = vpop.f32.mrf.mxu3 }
 0x21b   : > { %v877_v11 = vsel %vm876_vm8, %v1270_v59, %v873_v6  ;;  %v885_v12 = vmul.f32 %v1274_v7, %v728_v61  ;;  %v661_v13 = vadd.f32 %v1555_v28, %v660_v10  ;;  %vm890_vm10 = vweird.f32 %v1274_v7 }
 0x21c   : > { %v882_v14 = vsel %vm879_vm9, %v881_v8, %v877_v11  ;;  %1275 = vrcp.f32 %v729_v9  ;;  %vm891_vm12 = vmor %vm889_vm11, %vm890_vm10  ;;  %v910_v32 = vand.u32 2147483648, %v729_v9  ;;  %v908_v36 = vand.u32 2147483647, %v729_v9 }
 0x21d   : > { %983 = vst [vmem:[%s1564_s18 + $0x48] sm:$0xff] %v882_v14  ;;  %v886_v15 = vsub.f32 1.0, %v885_v12  ;;  %v682_v16 = vsub.f32 0.0, %v661_v13  ;;  %vm904_vm15 = vweird.f32 %v729_v9 }
 0x21e   : > { %v911_v40 = vor.u32 1.1754944e-38, %v910_v32  ;;  %vm909_vm1 = vcmp.eq.f32.partialorder %v908_v36, 8.507059e+37 }
 0x21f   : > { %v887_v18 = vmul.f32 %v1274_v7, %v886_v15  ;;  %v710_v20 = vmul.f32 1.442695, %v682_v16 }
 0x221   : > { %v888_v21 = vadd.f32 %v1274_v7, %v887_v18  ;;  %1277 = vpow2.f32 %v710_v20 }
 0x222   : > { %v1276_v22 = vpop.eup %1275  ;;  %v662_v24 = vpop.f32.mrf.mxu3 }
 0x223   : > { %v892_v25 = vsel %vm891_vm12, %v1274_v7, %v888_v21  ;;  %v900_v26 = vmul.f32 %v1276_v22, %v729_v9  ;;  %v663_v27 = vadd.f32 %v1555_v28, %v662_v24  ;;  %vm905_vm14 = vweird.f32 %v1276_v22 }
 0x224   : > { %v897_v29 = vsel %vm894_vm13, %v896_v23, %v892_v25  ;;  %vm906_vm0 = vmor %vm904_vm15, %vm905_vm14 }
 0x225   : > { %984 = vst [vmem:[%s1564_s18 + $0x50] sm:$0xff] %v897_v29  ;;  %v901_v30 = vsub.f32 1.0, %v900_v26  ;;  %v683_v31 = vsub.f32 0.0, %v663_v27 }
 0x227   : > { %v1278_v33 = vpop.eup %1277  ;;  %v902_v34 = vmul.f32 %v1276_v22, %v901_v30  ;;  %v712_v37 = vmul.f32 1.442695, %v683_v31 }
 0x228   : > { %v730_v38 = vadd.f32 1.0, %v1278_v33 }
 0x229   : > { %v903_v39 = vadd.f32 %v1276_v22, %v902_v34  ;;  %1279 = vpow2.f32 %v712_v37 }
 0x22a   : > { %1281 = vrcp.f32 %v730_v38  ;;  %v665_v41 = vpop.f32.mrf.mxu3  ;;  %v925_v53 = vand.u32 2147483648, %v730_v38  ;;  %v923_v55 = vand.u32 2147483647, %v730_v38  ;;  %vm919_vm3 = vweird.f32 %v730_v38 }
 0x22b   : > { %v907_v42 = vsel %vm906_vm0, %v1276_v22, %v903_v39  ;;  %v666_v43 = vadd.f32 %v1555_v28, %v665_v41 }
 0x22c   : > { %v912_v44 = vsel %vm909_vm1, %v911_v40, %v907_v42  ;;  %v926_v61 = vor.u32 1.1754944e-38, %v925_v53  ;;  %vm924_vm5 = vcmp.eq.f32.partialorder %v923_v55, 8.507059e+37 }
 0x22d   : > { %985 = vst [vmem:[%s1564_s18 + $0x58] sm:$0xff] %v912_v44  ;;  %v684_v45 = vsub.f32 0.0, %v666_v43 }
 0x22f   : > { %v1280_v46 = vpop.eup %1279  ;;  %v714_v35 = vmul.f32 1.442695, %v684_v45 }
 0x230   : > { %v1282_v47 = vpop.eup %1281  ;;  %v731_v48 = vadd.f32 1.0, %v1280_v46 }
 0x231   : > { %v915_v49 = vmul.f32 %v1282_v47, %v730_v38  ;;  %1283 = vpow2.f32 %v714_v35  ;;  %vm920_vm2 = vweird.f32 %v1282_v47 }
 0x232   : > { %1285 = vrcp.f32 %v731_v48  ;;  %v667_v50 = vpop.f32.mrf.mxu3  ;;  %vm921_vm4 = vmor %vm919_vm3, %vm920_vm2  ;;  %v940_v2 = vand.u32 2147483648, %v731_v48  ;;  %v938_v4 = vand.u32 2147483647, %v731_v48  ;;  %vm934_vm7 = vweird.f32 %v731_v48 }
 0x233   : > { %v916_v51 = vsub.f32 1.0, %v915_v49  ;;  %v668_v52 = vadd.f32 %v1555_v28, %v667_v50 }
 0x234   : > { %v941_v8 = vor.u32 1.1754944e-38, %v940_v2  ;;  %vm939_vm9 = vcmp.eq.f32.partialorder %v938_v4, 8.507059e+37 }
 0x235   : > { %v917_v54 = vmul.f32 %v1282_v47, %v916_v51  ;;  %v685_v56 = vsub.f32 0.0, %v668_v52 }
 0x237   : > { %v1284_v57 = vpop.eup %1283  ;;  %v918_v58 = vadd.f32 %v1282_v47, %v917_v54  ;;  %v716_v59 = vmul.f32 1.442695, %v685_v56 }
 0x238   : > { %v1286_v60 = vpop.eup %1285  ;;  %v732_v62 = vadd.f32 1.0, %v1284_v57 }
 0x239   : > { %v922_v63 = vsel %vm921_vm4, %v1282_v47, %v918_v58  ;;  %v930_v0 = vmul.f32 %v1286_v60, %v731_v48  ;;  %1287 = vpow2.f32 %v716_v59  ;;  %vm935_vm6 = vweird.f32 %v1286_v60 }
 0x23a   : > { %v927_v1 = vsel %vm924_vm5, %v926_v61, %v922_v63  ;;  %1289 = vrcp.f32 %v732_v62  ;;  %vm936_vm8 = vmor %vm934_vm7, %vm935_vm6  ;;  %v955_v14 = vand.u32 2147483648, %v732_v62  ;;  %v953_v16 = vand.u32 2147483647, %v732_v62 }
 0x23b   : > { %986 = vst [vmem:[%s1564_s18 + $0x60] sm:$0xff] %v927_v1  ;;  %v931_v28 = vsub.f32 1.0, %v930_v0  ;;  %vm949_vm11 = vweird.f32 %v732_v62 }
 0x23c   : > { %v956_v19 = vor.u32 1.1754944e-38, %v955_v14  ;;  %vm954_vm13 = vcmp.eq.f32.partialorder %v953_v16, 8.507059e+37 }
 0x23d   : > { %v932_v3 = vmul.f32 %v1286_v60, %v931_v28 }
 0x23f   : > { %v1288_v5 = vpop.eup %1287  ;;  %v933_v6 = vadd.f32 %v1286_v60, %v932_v3 }
 0x240   : > { %v1290_v7 = vpop.eup %1289  ;;  %v733_v9 = vadd.f32 1.0, %v1288_v5 }
 0x241   : > { %v937_v10 = vsel %vm936_vm8, %v1286_v60, %v933_v6  ;;  %v945_v11 = vmul.f32 %v1290_v7, %v732_v62  ;;  %vm950_vm10 = vweird.f32 %v1290_v7 }
 0x242   : > { %v942_v12 = vsel %vm939_vm9, %v941_v8, %v937_v10  ;;  %1291 = vrcp.f32 %v733_v9  ;;  %vm951_vm12 = vmor %vm949_vm11, %vm950_vm10  ;;  %v970_v24 = vand.u32 2147483648, %v733_v9  ;;  %v968_v26 = vand.u32 2147483647, %v733_v9 }
 0x243   : > { %987 = vst [vmem:[%s1564_s18 + $0x68] sm:$0xff] %v942_v12  ;;  %v946_v13 = vsub.f32 1.0, %v945_v11  ;;  %vm964_vm15 = vweird.f32 %v733_v9 }
 0x244   : > { %v971_v29 = vor.u32 1.1754944e-38, %v970_v24  ;;  %vm969_vm1 = vcmp.eq.f32.partialorder %v968_v26, 8.507059e+37 }
 0x245   : > { %v947_v15 = vmul.f32 %v1290_v7, %v946_v13 }
 0x247   : > { %v948_v17 = vadd.f32 %v1290_v7, %v947_v15 }
 0x248   : > { %v1292_v18 = vpop.eup %1291 }
 0x249   : > { %v952_v20 = vsel %vm951_vm12, %v1290_v7, %v948_v17  ;;  %v960_v21 = vmul.f32 %v1292_v18, %v733_v9  ;;  %vm965_vm14 = vweird.f32 %v1292_v18 }
 0x24a   : > { %v957_v22 = vsel %vm954_vm13, %v956_v19, %v952_v20  ;;  %vm966_vm0 = vmor %vm964_vm15, %vm965_vm14 }
 0x24b   : > { %988 = vst [vmem:[%s1564_s18 + $0x70] sm:$0xff] %v957_v22  ;;  %v961_v23 = vsub.f32 1.0, %v960_v21 }
 0x24d   : > { %v962_v25 = vmul.f32 %v1292_v18, %v961_v23 }
 0x24f   : > { %v963_v27 = vadd.f32 %v1292_v18, %v962_v25 }
 0x251   : > { %v967_v30 = vsel %vm966_vm0, %v1292_v18, %v963_v27 }
 0x252   : > { %v972_v31 = vsel %vm969_vm1, %v971_v29, %v967_v30 }
 0x253   : > { %989 = vst [vmem:[%s1564_s18 + $0x78] sm:$0xff] %v972_v31 }
 0x254   : > { %1320 = shalt.err (!%p1317_p3)
}
 0x255   : > { %s1357_s16 = smov 128   ;;  %s1358_s18 = smov 8  }
 0x256   : > { %1185 = dma.vmem_to_hbm [thread:$0]  (%p1437_p5), %s1004_s28, 2048, %s1006_s29, %s991_s19, %s1357_s16, %s1357_s16, %s1358_s18  }
 0x257 PF: > { %p1191_p4 = scmp.ge.s32.totalorder %s1355_s27, 2  ;;  %s1020_s21 = sand.u32 1, %s1343_s24  }
 0x258   : > { %s1021_s22 = scalar_lea.sflag [#allocation3], %s1020_s21 }
 0x259   : > { %p1188_p7 = pnand %p1191_p4, %p1441_p6 }
 0x25b   : > { %p1189_p8 = pneg %p1188_p7 }
 0x25d   : > { %1338 = dma.done.wait (%p1189_p8), %s1021_s22, 2048  }
 0x25e   : > { %1340 = vsyncadd (%p1189_p8), %s1021_s22, 4294965248  ;;  %p17_p9 = scmp.ge.s32.totalorder %s1424_s30, 4   ;;  %s1638_s24 = smov %s1347_s25 }
 0x25f   : > { %s1639_s25 = smov %s1351_s26  ;;  %s1640_s26 = smov %s1435_s10 }
 0x260   : > { %s1641_s27 = smov %s1424_s30  ;;  %19 = sbr.rel (!%p17_p9) target bundleno = 3 (0x3), region = 83 }
 0x265   :  { %1027 = vsyncpa [#allocation3], 1 }
 0x266   :  { %1029 = vsyncpa [#allocation3 + $0x1], 1 }

// kernel: tpu_custom_call.1
= control target key start
LH: loop header
LB: loop body
LE: loop exit
PB: predicated region body
PF: predicated region fallthrough
CT: control target
= control target key end

     0   :  { %12 = vsyncpa [#allocation3], 0  ;;  %s1628_s0 = inlined_call_operand.vmem [shape: f32[256,8], index: 0, kind: input, shape index: {}]   ;;  %s1629_s1 = inlined_call_operand.vmem [shape: bf16[8,128], index: 1, kind: input, shape index: {}]   ;;  %s1630_s2 = inlined_call_operand.vmem [shape: f32[1,128], index: 2, kind: input, shape index: {}]   ;;  %s1631_s3 = inlined_call_operand.vmem [shape: bf16[128,128], index: 3, kind: input, shape index: {}]   ;;  %s1632_s4 = inlined_call_operand.vmem [shape: f32[1,128], index: 4, kind: input, shape index: {}]   ;;  %s1633_s5 = inlined_call_operand.vmem [shape: bf16[128,128], index: 5, kind: input, shape index: {}]   ;;  %s1634_s6 = inlined_call_operand.vmem [shape: f32[1,128], index: 6, kind: input, shape index: {}]   ;;  %s1635_s7 = inlined_call_operand.hbm [shape: f32[256,128], index: 7, kind: output, shape index: {}]  }
   0x1   :  { %14 = vsyncpa [#allocation3 + $0x1], 0  ;;  %s1399_s24 = smov 0   ;;  %s1401_s25 = smov 0  }
   0x2   :  { %s1403_s26 = smov 0   ;;  %s1405_s27 = smov 0  }
   0x3 LB: > { %s1420_s28 = sadd.s32 4294967295, %s1355_s27   ;;  %s1068_s29 = sadd.s32 4294967294, %s1355_s27   ;;  %s1355_s27 = sphi %s1405_s27, %s1641_s27   ;;  %s1351_s26 = sphi %s1403_s26, %s1640_s26   ;;  %s1347_s25 = sphi %s1401_s25, %s1639_s25   ;;  %s1343_s24 = sphi %s1399_s24, %s1638_s24  }
   0x4   : > { %s1424_s30 = sadd.s32 1, %s1355_s27   ;;  %s179_s8 = sadd.s32 1, %s1351_s26 }
   0x5   : > { %s176_s9 = ssub.s32 %s1355_s27, %s1424_s30  ;;  %p189_p0 = scmp.ne.s32.totalorder %s1351_s26, %s1347_s25 }
   0x6   : > { %p177_p1 = scmp.eq.s32.totalorder %s176_s9, 0  ;;  %p190_p2 = scmp.eq.s32.totalorder %s1420_s28, 1 }
   0x7   : > { %p195_p3 = scmp.ne.s32.totalorder %s1347_s25, %s1343_s24  ;;  %p196_p4 = scmp.eq.s32.totalorder %s1068_s29, 1 }
   0x8   : > { %s1435_s10 = scalar_select %p177_p1, %s1351_s26, %s179_s8  }
   0x9   : > { %p1437_p5 = por %p190_p2, %p189_p0  ;;  %p1441_p6 = por %p196_p4, %p195_p3 }
   0xa   : > { %p1071_p7 = scmp.ge.s32.totalorder %s1355_s27, 1  ;;  %p241_p8 = scmp.lt.s32.totalorder %s1355_s27, 3 }
   0xc   : > { %p242_p9 = pnand %p1071_p7, %p241_p8 }
   0xd   : > { %s1073_s15 = sshll.u32 (!%p242_p9), %s1420_s28, 4  ;;  %s1168_s20 = sshll.u32 (!%p242_p9), %s1420_s28, 7 }
   0xe   : > { %245 = sbr.rel (%p242_p9) target bundleno = 599 (0x257), region = 48  ;;  %p274_p10 = scmp.lt.s32.totalorder (!%p242_p9), %s1073_s15, 31 }
   0xf   : > { %s1002_s23 = scalar_lea.hbm (!%p242_p9), %s1635_s7, %s1168_s20 }
  0x10   : > { %s1005_s29 = sshll.u32 (!%p242_p9), %s1002_s23, 4  ;;  %s1006_s29 = int_to_ptr.hbm [resolvable:$true] %s1005_s29 }
  0x11   : > { %s1307_s8 = sshra.s32 (!%p242_p9), %s1006_s29, 4  ;;  %s1308_s8 = int_to_ptr.hbm [resolvable:$true] %s1307_s8 }
  0x12   : > { %s1309_s9 = scalar_lea.hbm (!%p242_p9), %s1308_s8, 128  ;;  %p1314_p0 = scmp.lt.s32.totalorder (!%p242_p9), %s1308_s8, %s1635_s7 }
  0x13   : > { %v297_v0 = vld [vmem:[%s1629_s1] sm:$0xf]  ;;  %vm335_vm0 = vcmask 1043456   ;;  %s1643_s15 = smov (!%p274_p10, %s1073_s15), 31  ;;  %vm310_vm1 = vcmask 64512   ;;  %v1159_v17 = vld [vmem:[%s1631_s3 + $0x38] sm:$0xff]  ;;  %p1310_p11 = scmp.ne.s32.totalorder %s1308_s8, %s1309_s9 }
  0x14   : > { %v337_v1 = vsel %vm335_vm0, %v297_v0, 0  ;;  %s1074_s16 = sshll.u32 %s1643_s15, 3  ;;  %480 = vmatpush.bf16.msra.mxu1 %v1159_v17  ;;  %1169 = vmatpush.bf16.msra.mxu3 %v1159_v17  ;;  %v1158_v21 = vld [vmem:[%s1631_s3 + $0x30] sm:$0xff]  ;;  %v1157_v22 = vld [vmem:[%s1631_s3 + $0x28] sm:$0xff]  ;;  %v1156_v23 = vld [vmem:[%s1631_s3 + $0x20] sm:$0xff]  ;;  %s1313_s15 = scalar_lea.hbm %s1635_s7, 256 }
  0x15   : > { %346 = vmatpush.bf16.msra.mxu0 %v337_v1  ;;  %s1454_s19 = scalar_lea.vmem %s1628_s0, %s1074_s16  ;;  %v1155_v26 = vld [vmem:[%s1631_s3 + $0x18] sm:$0xff]  ;;  %v1154_v28 = vld [vmem:[%s1631_s3 + $0x10] sm:$0xff]  ;;  %v1153_v29 = vld [vmem:[%s1631_s3 + $0x8] sm:$0xff]  ;;  %s270_s16 = sand.u32 1, %s1347_s25  }
  0x16   : > { %v281_v2 = vld [vmem:[%s1454_s19] sm:$0xff]  ;;  %v282_v3 = vld [vmem:[%s1454_s19 + $0x8] sm:$0xff]  ;;  %v283_v5 = vld [vmem:[%s1454_s19 + $0x10] sm:$0xff]  ;;  %s1072_s17 = sshll.u32 %s270_s16, 7  ;;  %p1311_p12 = pnand %p1310_p11, %p1437_p5 }
  0x17   : > { %v299_v4 = vpack.c.bf16 %v282_v3, %v281_v2  ;;  %v284_v6 = vld [vmem:[%s1454_s19 + $0x18] sm:$0xff]  ;;  %v285_v8 = vld [vmem:[%s1454_s19 + $0x20] sm:$0xff]  ;;  %v286_v9 = vld [vmem:[%s1454_s19 + $0x28] sm:$0xff]  ;;  %s1564_s18 = scalar_lea.vmem [#allocation2], %s1072_s17  ;;  %p1315_p1 = scmp.lt.s32.totalorder %s1313_s15, %s1309_s9 }
  0x18   : > { %v300_v7 = vpack.c.bf16 %v284_v6, %v283_v5  ;;  %v301_v10 = vpack.c.bf16 %v286_v9, %v285_v8  ;;  %v287_v11 = vld [vmem:[%s1454_s19 + $0x30] sm:$0xff]  ;;  %v288_v12 = vld [vmem:[%s1454_s19 + $0x38] sm:$0xff]  ;;  %v289_v14 = vld [vmem:[%s1454_s19 + $0x40] sm:$0xff]  ;;  %481 = vmatpush.bf16.msra.mxu1 %v1158_v21  ;;  %1170 = vmatpush.bf16.msra.mxu3 %v1158_v21  ;;  %s1003_s28 = sshll.u32 %s1564_s18, 4  ;;  %p1312_p13 = pneg %p1311_p12  ;;  %s1004_s28 = int_to_ptr.vmem [resolvable:$true] %s1003_s28 }
  0x19   : > { %1075 = vmatmul.msk.bf16.vlgmr.msra.gmra.mxu0 %vm310_vm1, %v299_v4  ;;  %v302_v13 = vpack.c.bf16 %v288_v12, %v287_v11  ;;  %v290_v15 = vld [vmem:[%s1454_s19 + $0x48] sm:$0xff]  ;;  %v291_v18 = vld [vmem:[%s1454_s19 + $0x50] sm:$0xff]  ;;  %v292_v19 = vld [vmem:[%s1454_s19 + $0x58] sm:$0xff]  ;;  %p1316_p2 = por %p1315_p1, %p1314_p0 }
  0x1a   : > { %v303_v16 = vpack.c.bf16 %v290_v15, %v289_v14  ;;  %v304_v20 = vpack.c.bf16 %v292_v19, %v291_v18  ;;  %v293_v24 = vld [vmem:[%s1454_s19 + $0x60] sm:$0xff]  ;;  %v294_v25 = vld [vmem:[%s1454_s19 + $0x68] sm:$0xff]  ;;  %v295_v31 = vld [vmem:[%s1454_s19 + $0x70] sm:$0xff] }
  0x1b   : > { %v305_v27 = vpack.c.bf16 %v294_v25, %v293_v24  ;;  %v1152_v30 = vld [vmem:[%s1631_s3] sm:$0xff]  ;;  %v296_v32 = vld [vmem:[%s1454_s19 + $0x78] sm:$0xff]  ;;  %v1166_v14 = vld [vmem:[%s1633_s5 + $0x30] sm:$0xff]  ;;  %s991_s19 = scalar_lea.sflag [#allocation3], %s270_s16  ;;  %p1317_p3 = pnand %p1316_p2, %p1312_p13 }
  0x1c   : > { %482 = vmatpush.bf16.msra.mxu1 %v1157_v22  ;;  %1171 = vmatpush.bf16.msra.mxu3 %v1157_v22  ;;  %v306_v33 = vpack.c.bf16 %v296_v32, %v295_v31  ;;  %v1507_v35 = vld [vmem:[%s1630_s2] ss:$0 sm:$0xff]  ;;  %v1163_v21 = vld [vmem:[%s1633_s5 + $0x18] sm:$0xff]  ;;  %v1162_v25 = vld [vmem:[%s1633_s5 + $0x10] sm:$0xff] }
  0x1d   : > { %v1164_v17 = vld [vmem:[%s1633_s5 + $0x20] sm:$0xff] }
  0x20   : > { %483 = vmatpush.bf16.msra.mxu1 %v1156_v23  ;;  %1172 = vmatpush.bf16.msra.mxu3 %v1156_v23 }
  0x24   : > { %484 = vmatpush.bf16.msra.mxu1 %v1155_v26  ;;  %1173 = vmatpush.bf16.msra.mxu3 %v1155_v26 }
  0x28   : > { %485 = vmatpush.bf16.msra.mxu1 %v1154_v28  ;;  %1174 = vmatpush.bf16.msra.mxu3 %v1154_v28  ;;  %v1160_v28 = vld [vmem:[%s1633_s5] sm:$0xff] }
  0x29   : > { %1076 = vmatmul.msk.bf16.gmra.mxu0 %vm310_vm1, %v300_v7 }
  0x2c   : > { %486 = vmatpush.bf16.msra.mxu1 %v1153_v29  ;;  %1175 = vmatpush.bf16.msra.mxu3 %v1153_v29 }
  0x30   : > { %487 = vmatpush.bf16.msra.mxu1 %v1152_v30  ;;  %1176 = vmatpush.bf16.msra.mxu3 %v1152_v30 }
  0x39   : > { %1077 = vmatmul.msk.bf16.gmra.mxu0 %vm310_vm1, %v301_v10  ;;  %v1167_v10 = vld [vmem:[%s1633_s5 + $0x38] sm:$0xff] }
  0x3a   : > { %621 = vmatpush.bf16.msra.mxu2 %v1167_v10  ;;  %1177 = vmatpush.bf16.msrb.mxu3 %v1167_v10 }
  0x3e   : > { %622 = vmatpush.bf16.msra.mxu2 %v1166_v14  ;;  %1178 = vmatpush.bf16.msrb.mxu3 %v1166_v14 }
  0x49   : > { %1078 = vmatmul.msk.bf16.gmra.mxu0 %vm310_vm1, %v302_v13 }
  0x59   : > { %1079 = vmatmul.msk.bf16.gmra.mxu0 %vm310_vm1, %v303_v16  ;;  %v1165_v16 = vld [vmem:[%s1633_s5 + $0x28] sm:$0xff] }
  0x5a   : > { %623 = vmatpush.bf16.msra.mxu2 %v1165_v16  ;;  %1179 = vmatpush.bf16.msrb.mxu3 %v1165_v16 }
  0x5e   : > { %624 = vmatpush.bf16.msra.mxu2 %v1164_v17  ;;  %1180 = vmatpush.bf16.msrb.mxu3 %v1164_v17 }
  0x62   : > { %625 = vmatpush.bf16.msra.mxu2 %v1163_v21  ;;  %1181 = vmatpush.bf16.msrb.mxu3 %v1163_v21 }
  0x66   : > { %626 = vmatpush.bf16.msra.mxu2 %v1162_v25  ;;  %1182 = vmatpush.bf16.msrb.mxu3 %v1162_v25 }
  0x69   : > { %1080 = vmatmul.msk.bf16.gmra.mxu0 %vm310_vm1, %v304_v20 }
  0x79   : > { %1081 = vmatmul.msk.bf16.gmra.mxu0 %vm310_vm1, %v305_v27  ;;  %v1161_v27 = vld [vmem:[%s1633_s5 + $0x8] sm:$0xff] }
  0x7a   : > { %627 = vmatpush.bf16.msra.mxu2 %v1161_v27  ;;  %1183 = vmatpush.bf16.msrb.mxu3 %v1161_v27 }
  0x7e   : > { %628 = vmatpush.bf16.msra.mxu2 %v1160_v28  ;;  %1184 = vmatpush.bf16.msrb.mxu3 %v1160_v28  ;;  %v1555_v28 = vld [vmem:[%s1634_s6] ss:$0 sm:$0xff] }
  0x89   : > { %1082 = vmatmul.msk.bf16.gmra.mxu0 %vm310_vm1, %v306_v33 }
  0x96   : > { %v348_v34 = vpop.f32.mrf.mxu0 }
  0x97   : > { %v349_v36 = vadd.f32 %v1507_v35, %v348_v34 }
  0x99   : > { %v388_v39 = vmax.f32 %v349_v36, 0.0 }
  0x9e   : > { %v350_v37 = vpop.f32.mrf.mxu0 }
  0x9f   : > { %v351_v38 = vadd.f32 %v1507_v35, %v350_v37  ;;  %v1227_v37 = vld [vmem:[%s1632_s4] ss:$0 sm:$0xff] }
  0xa1   : > { %v389_v40 = vmax.f32 %v351_v38, 0.0 }
  0xa3   : > { %v421_v41 = vpack.c.bf16 %v389_v40, %v388_v39 }
  0xa5   : > { %488 = vmatmul.bf16.vlgmr.msra.gmra.mxu1 %v421_v41 }
  0xa6   : > { %v353_v42 = vpop.f32.mrf.mxu0 }
  0xa7   : > { %v354_v43 = vadd.f32 %v1507_v35, %v353_v42 }
  0xa9   : > { %v390_v46 = vmax.f32 %v354_v43, 0.0 }
  0xae   : > { %v355_v44 = vpop.f32.mrf.mxu0 }
  0xaf   : > { %v356_v45 = vadd.f32 %v1507_v35, %v355_v44 }
  0xb1   : > { %v391_v47 = vmax.f32 %v356_v45, 0.0 }
  0xb3   : > { %v422_v48 = vpack.c.bf16 %v391_v47, %v390_v46 }
  0xb5   : > { %493 = vmatmul.bf16.gmra.mxu1 %v422_v48 }
  0xb6   : > { %v358_v49 = vpop.f32.mrf.mxu0 }
  0xb7   : > { %v359_v50 = vadd.f32 %v1507_v35, %v358_v49 }
  0xb9   : > { %v392_v53 = vmax.f32 %v359_v50, 0.0 }
  0xbe   : > { %v360_v51 = vpop.f32.mrf.mxu0 }
  0xbf   : > { %v361_v52 = vadd.f32 %v1507_v35, %v360_v51 }
  0xc1   : > { %v393_v54 = vmax.f32 %v361_v52, 0.0 }
  0xc3   : > { %v423_v55 = vpack.c.bf16 %v393_v54, %v392_v53 }
  0xc5   : > { %498 = vmatmul.bf16.gmra.mxu1 %v423_v55 }
  0xc6   : > { %v363_v56 = vpop.f32.mrf.mxu0 }
  0xc7   : > { %v364_v57 = vadd.f32 %v1507_v35, %v363_v56 }
  0xc9   : > { %v394_v60 = vmax.f32 %v364_v57, 0.0 }
  0xce   : > { %v365_v58 = vpop.f32.mrf.mxu0 }
  0xcf   : > { %v366_v59 = vadd.f32 %v1507_v35, %v365_v58 }
  0xd1   : > { %v395_v61 = vmax.f32 %v366_v59, 0.0 }
  0xd3   : > { %v424_v62 = vpack.c.bf16 %v395_v61, %v394_v60 }
  0xd5   : > { %503 = vmatmul.bf16.gmra.mxu1 %v424_v62 }
  0xd6   : > { %v368_v63 = vpop.f32.mrf.mxu0 }
  0xd7   : > { %v369_v0 = vadd.f32 %v1507_v35, %v368_v63 }
  0xd9   : > { %v396_v3 = vmax.f32 %v369_v0, 0.0 }
  0xde   : > { %v370_v1 = vpop.f32.mrf.mxu0 }
  0xdf   : > { %v371_v2 = vadd.f32 %v1507_v35, %v370_v1 }
  0xe1   : > { %v397_v4 = vmax.f32 %v371_v2, 0.0 }
  0xe3   : > { %v425_v5 = vpack.c.bf16 %v397_v4, %v396_v3 }
  0xe5   : > { %508 = vmatmul.bf16.gmra.mxu1 %v425_v5 }
  0xe6   : > { %v373_v6 = vpop.f32.mrf.mxu0 }
  0xe7   : > { %v374_v7 = vadd.f32 %v1507_v35, %v373_v6 }
  0xe9   : > { %v398_v11 = vmax.f32 %v374_v7, 0.0 }
  0xee   : > { %v375_v8 = vpop.f32.mrf.mxu0 }
  0xef   : > { %v376_v9 = vadd.f32 %v1507_v35, %v375_v8 }
  0xf1   : > { %v399_v12 = vmax.f32 %v376_v9, 0.0 }
  0xf3   : > { %v426_v13 = vpack.c.bf16 %v399_v12, %v398_v11 }
  0xf5   : > { %513 = vmatmul.bf16.gmra.mxu1 %v426_v13 }
  0xf6   : > { %v378_v15 = vpop.f32.mrf.mxu0 }
  0xf7   : > { %v379_v18 = vadd.f32 %v1507_v35, %v378_v15 }
  0xf9   : > { %v400_v22 = vmax.f32 %v379_v18, 0.0 }
  0xfe   : > { %v380_v19 = vpop.f32.mrf.mxu0 }
  0xff   : > { %v381_v20 = vadd.f32 %v1507_v35, %v380_v19 }
 0x101   : > { %v401_v23 = vmax.f32 %v381_v20, 0.0 }
 0x103   : > { %v427_v24 = vpack.c.bf16 %v401_v23, %v400_v22 }
 0x105   : > { %518 = vmatmul.bf16.vlgmr.msra.gmra.mxu3 %v427_v24 }
 0x106   : > { %v383_v26 = vpop.f32.mrf.mxu0 }
 0x107   : > { %v384_v29 = vadd.f32 %v1507_v35, %v383_v26 }
 0x109   : > { %v402_v32 = vmax.f32 %v384_v29, 0.0 }
 0x10e   : > { %v385_v30 = vpop.f32.mrf.mxu0 }
 0x10f   : > { %v386_v31 = vadd.f32 %v1507_v35, %v385_v30 }
 0x111   : > { %v403_v33 = vmax.f32 %v386_v31, 0.0 }
 0x113   : > { %v428_v34 = vpack.c.bf16 %v403_v33, %v402_v32 }
 0x115   : > { %523 = vmatmul.bf16.gmra.mxu3 %v428_v34 }
 0x122   : > { %v489_v36 = vpop.f32.mrf.mxu1 }
 0x123   : > { %v490_v38 = vadd.f32 %v1227_v37, %v489_v36 }
 0x125   : > { %v529_v41 = vmax.f32 %v490_v38, 0.0 }
 0x12a   : > { %v491_v39 = vpop.f32.mrf.mxu1 }
 0x12b   : > { %v492_v40 = vadd.f32 %v1227_v37, %v491_v39 }
 0x12d   : > { %v530_v42 = vmax.f32 %v492_v40, 0.0 }
 0x12f   : > { %v562_v43 = vpack.c.bf16 %v530_v42, %v529_v41 }
 0x131   : > { %629 = vmatmul.bf16.vlgmr.msra.gmra.mxu2 %v562_v43 }
 0x132   : > { %v494_v44 = vpop.f32.mrf.mxu1 }
 0x133   : > { %v495_v45 = vadd.f32 %v1227_v37, %v494_v44 }
 0x135   : > { %v531_v47 = vmax.f32 %v495_v45, 0.0 }
 0x13a   : > { %v496_v46 = vpop.f32.mrf.mxu1 }
 0x13b   : > { %v497_v35 = vadd.f32 %v1227_v37, %v496_v46 }
 0x13d   : > { %v532_v48 = vmax.f32 %v497_v35, 0.0 }
 0x13f   : > { %v563_v49 = vpack.c.bf16 %v532_v48, %v531_v47 }
 0x141   : > { %634 = vmatmul.bf16.gmra.mxu2 %v563_v49 }
 0x142   : > { %v499_v50 = vpop.f32.mrf.mxu1 }
 0x143   : > { %v500_v51 = vadd.f32 %v1227_v37, %v499_v50 }
 0x145   : > { %v533_v54 = vmax.f32 %v500_v51, 0.0 }
 0x14a   : > { %v501_v52 = vpop.f32.mrf.mxu1 }
 0x14b   : > { %v502_v53 = vadd.f32 %v1227_v37, %v501_v52 }
 0x14d   : > { %v534_v55 = vmax.f32 %v502_v53, 0.0 }
 0x14f   : > { %v564_v56 = vpack.c.bf16 %v534_v55, %v533_v54 }
 0x151   : > { %639 = vmatmul.bf16.gmra.mxu2 %v564_v56 }
 0x152   : > { %v504_v57 = vpop.f32.mrf.mxu1 }
 0x153   : > { %v505_v58 = vadd.f32 %v1227_v37, %v504_v57 }
 0x155   : > { %v535_v61 = vmax.f32 %v505_v58, 0.0 }
 0x15a   : > { %v506_v59 = vpop.f32.mrf.mxu1 }
 0x15b   : > { %v507_v60 = vadd.f32 %v1227_v37, %v506_v59 }
 0x15d   : > { %v536_v62 = vmax.f32 %v507_v60, 0.0 }
 0x15f   : > { %v565_v63 = vpack.c.bf16 %v536_v62, %v535_v61 }
 0x161   : > { %644 = vmatmul.bf16.gmra.mxu2 %v565_v63 }
 0x162   : > { %v509_v0 = vpop.f32.mrf.mxu1 }
 0x163   : > { %v510_v1 = vadd.f32 %v1227_v37, %v509_v0 }
 0x165   : > { %v537_v4 = vmax.f32 %v510_v1, 0.0 }
 0x16a   : > { %v511_v2 = vpop.f32.mrf.mxu1 }
 0x16b   : > { %v512_v3 = vadd.f32 %v1227_v37, %v511_v2 }
 0x16d   : > { %v538_v5 = vmax.f32 %v512_v3, 0.0 }
 0x16f   : > { %v566_v6 = vpack.c.bf16 %v538_v5, %v537_v4 }
 0x171   : > { %649 = vmatmul.bf16.gmra.mxu2 %v566_v6 }
 0x172   : > { %v514_v7 = vpop.f32.mrf.mxu1 }
 0x173   : > { %v515_v8 = vadd.f32 %v1227_v37, %v514_v7 }
 0x175   : > { %v539_v11 = vmax.f32 %v515_v8, 0.0 }
 0x17a   : > { %v516_v9 = vpop.f32.mrf.mxu1 }
 0x17b   : > { %v517_v10 = vadd.f32 %v1227_v37, %v516_v9 }
 0x17d   : > { %v540_v12 = vmax.f32 %v517_v10, 0.0 }
 0x17f   : > { %v567_v13 = vpack.c.bf16 %v540_v12, %v539_v11 }
 0x181   : > { %654 = vmatmul.bf16.gmra.mxu2 %v567_v13 }
 0x188   : > { %v519_v14 = vpop.f32.mrf.mxu3 }
 0x189   : > { %v520_v15 = vadd.f32 %v1227_v37, %v519_v14 }
 0x18b   : > { %v541_v18 = vmax.f32 %v520_v15, 0.0 }
 0x190   : > { %v521_v16 = vpop.f32.mrf.mxu3 }
 0x191   : > { %v522_v17 = vadd.f32 %v1227_v37, %v521_v16 }
 0x193   : > { %v542_v19 = vmax.f32 %v522_v17, 0.0 }
 0x195   : > { %v568_v20 = vpack.c.bf16 %v542_v19, %v541_v18 }
 0x197   : > { %659 = vmatmul.bf16.vlgmr.msrb.gmra.mxu3 %v568_v20 }
 0x198   : > { %v524_v21 = vpop.f32.mrf.mxu3 }
 0x199   : > { %v525_v22 = vadd.f32 %v1227_v37, %v524_v21 }
 0x19b   : > { %v543_v25 = vmax.f32 %v525_v22, 0.0 }
 0x1a0   : > { %v526_v23 = vpop.f32.mrf.mxu3 }
 0x1a1   : > { %v527_v24 = vadd.f32 %v1227_v37, %v526_v23 }
 0x1a3   : > { %v544_v26 = vmax.f32 %v527_v24, 0.0 }
 0x1a5   : > { %v569_v27 = vpack.c.bf16 %v544_v26, %v543_v25 }
 0x1a7   : > { %664 = vmatmul.bf16.gmra.mxu3 %v569_v27 }
 0x1b4   : > { %v630_v29 = vpop.f32.mrf.mxu2 }
 0x1b5   : > { %v631_v30 = vadd.f32 %v1555_v28, %v630_v29 }
 0x1b7   : > { %v670_v31 = vsub.f32 0.0, %v631_v30 }
 0x1b9   : > { %v686_v32 = vmul.f32 1.442695, %v670_v31 }
 0x1bb   : > { %1229 = vpow2.f32 %v686_v32 }
 0x1bc   : > { %v632_v33 = vpop.f32.mrf.mxu2 }
 0x1bd   : > { %v633_v34 = vadd.f32 %v1555_v28, %v632_v33 }
 0x1bf   : > { %v671_v36 = vsub.f32 0.0, %v633_v34 }
 0x1c1   : > { %v1230_v37 = vpop.eup %1229  ;;  %v688_v38 = vmul.f32 1.442695, %v671_v36 }
 0x1c2   : > { %v718_v39 = vadd.f32 1.0, %v1230_v37 }
 0x1c3   : > { %1231 = vpow2.f32 %v688_v38 }
 0x1c4   : > { %1233 = vrcp.f32 %v718_v39  ;;  %v635_v40 = vpop.f32.mrf.mxu2  ;;  %v745_v50 = vand.u32 2147483648, %v718_v39  ;;  %v743_v52 = vand.u32 2147483647, %v718_v39  ;;  %vm739_vm3 = vweird.f32 %v718_v39 }
 0x1c5   : > { %v636_v41 = vadd.f32 %v1555_v28, %v635_v40 }
 0x1c6   : > { %v746_v58 = vor.u32 1.1754944e-38, %v745_v50  ;;  %vm744_vm5 = vcmp.eq.f32.partialorder %v743_v52, 8.507059e+37 }
 0x1c7   : > { %v672_v42 = vsub.f32 0.0, %v636_v41 }
 0x1c9   : > { %v1232_v43 = vpop.eup %1231  ;;  %v690_v44 = vmul.f32 1.442695, %v672_v42 }
 0x1ca   : > { %v1234_v45 = vpop.eup %1233  ;;  %v719_v46 = vadd.f32 1.0, %v1232_v43 }
 0x1cb   : > { %v735_v35 = vmul.f32 %v1234_v45, %v718_v39  ;;  %1235 = vpow2.f32 %v690_v44  ;;  %vm740_vm2 = vweird.f32 %v1234_v45 }
 0x1cc   : > { %1237 = vrcp.f32 %v719_v46  ;;  %v637_v47 = vpop.f32.mrf.mxu2  ;;  %vm741_vm4 = vmor %vm739_vm3, %vm740_vm2  ;;  %v760_v2 = vand.u32 2147483648, %v719_v46  ;;  %v758_v4 = vand.u32 2147483647, %v719_v46  ;;  %vm754_vm7 = vweird.f32 %v719_v46 }
 0x1cd   : > { %v736_v48 = vsub.f32 1.0, %v735_v35  ;;  %v638_v49 = vadd.f32 %v1555_v28, %v637_v47 }
 0x1ce   : > { %v761_v10 = vor.u32 1.1754944e-38, %v760_v2  ;;  %vm759_vm9 = vcmp.eq.f32.partialorder %v758_v4, 8.507059e+37 }
 0x1cf   : > { %v737_v51 = vmul.f32 %v1234_v45, %v736_v48  ;;  %v673_v53 = vsub.f32 0.0, %v638_v49 }
 0x1d1   : > { %v1236_v54 = vpop.eup %1235  ;;  %v738_v55 = vadd.f32 %v1234_v45, %v737_v51  ;;  %v692_v56 = vmul.f32 1.442695, %v673_v53 }
 0x1d2   : > { %v1238_v57 = vpop.eup %1237  ;;  %v720_v59 = vadd.f32 1.0, %v1236_v54 }
 0x1d3   : > { %v742_v60 = vsel %vm741_vm4, %v1234_v45, %v738_v55  ;;  %v750_v61 = vmul.f32 %v1238_v57, %v719_v46  ;;  %1239 = vpow2.f32 %v692_v56  ;;  %vm755_vm6 = vweird.f32 %v1238_v57 }
 0x1d4   : > { %v747_v62 = vsel %vm744_vm5, %v746_v58, %v742_v60  ;;  %1241 = vrcp.f32 %v720_v59  ;;  %v640_v63 = vpop.f32.mrf.mxu2  ;;  %vm756_vm8 = vmor %vm754_vm7, %vm755_vm6  ;;  %v775_v18 = vand.u32 2147483648, %v720_v59  ;;  %v773_v20 = vand.u32 2147483647, %v720_v59 }
 0x1d5   : > { %974 = vst [vmem:[%s1564_s18] sm:$0xff] %v747_v62  ;;  %v751_v0 = vsub.f32 1.0, %v750_v61  ;;  %v641_v1 = vadd.f32 %v1555_v28, %v640_v63  ;;  %vm769_vm11 = vweird.f32 %v720_v59 }
 0x1d6   : > { %v776_v26 = vor.u32 1.1754944e-38, %v775_v18  ;;  %vm774_vm13 = vcmp.eq.f32.partialorder %v773_v20, 8.507059e+37 }
 0x1d7   : > { %v752_v3 = vmul.f32 %v1238_v57, %v751_v0  ;;  %v674_v5 = vsub.f32 0.0, %v641_v1 }
 0x1d9   : > { %v1240_v6 = vpop.eup %1239  ;;  %v753_v7 = vadd.f32 %v1238_v57, %v752_v3  ;;  %v694_v8 = vmul.f32 1.442695, %v674_v5 }
 0x1da   : > { %v1242_v9 = vpop.eup %1241  ;;  %v721_v11 = vadd.f32 1.0, %v1240_v6 }
 0x1db   : > { %v757_v12 = vsel %vm756_vm8, %v1238_v57, %v753_v7  ;;  %v765_v13 = vmul.f32 %v1242_v9, %v720_v59  ;;  %1243 = vpow2.f32 %v694_v8  ;;  %vm770_vm10 = vweird.f32 %v1242_v9 }
 0x1dc   : > { %v762_v14 = vsel %vm759_vm9, %v761_v10, %v757_v12  ;;  %1245 = vrcp.f32 %v721_v11  ;;  %v642_v15 = vpop.f32.mrf.mxu2  ;;  %vm771_vm12 = vmor %vm769_vm11, %vm770_vm10  ;;  %v790_v36 = vand.u32 2147483648, %v721_v11  ;;  %v788_v38 = vand.u32 2147483647, %v721_v11 }
 0x1dd   : > { %975 = vst [vmem:[%s1564_s18 + $0x8] sm:$0xff] %v762_v14  ;;  %v766_v16 = vsub.f32 1.0, %v765_v13  ;;  %v643_v17 = vadd.f32 %v1555_v28, %v642_v15  ;;  %vm784_vm15 = vweird.f32 %v721_v11 }
 0x1de   : > { %v791_v44 = vor.u32 1.1754944e-38, %v790_v36  ;;  %vm789_vm1 = vcmp.eq.f32.partialorder %v788_v38, 8.507059e+37 }
 0x1df   : > { %v767_v19 = vmul.f32 %v1242_v9, %v766_v16  ;;  %v675_v21 = vsub.f32 0.0, %v643_v17 }
 0x1e1   : > { %v1244_v22 = vpop.eup %1243  ;;  %v768_v23 = vadd.f32 %v1242_v9, %v767_v19  ;;  %v696_v24 = vmul.f32 1.442695, %v675_v21 }
 0x1e2   : > { %v1246_v25 = vpop.eup %1245  ;;  %v722_v27 = vadd.f32 1.0, %v1244_v22 }
 0x1e3   : > { %v772_v29 = vsel %vm771_vm12, %v1242_v9, %v768_v23  ;;  %v780_v30 = vmul.f32 %v1246_v25, %v721_v11  ;;  %1247 = vpow2.f32 %v696_v24  ;;  %vm785_vm14 = vweird.f32 %v1246_v25 }
 0x1e4   : > { %v777_v31 = vsel %vm774_vm13, %v776_v26, %v772_v29  ;;  %1249 = vrcp.f32 %v722_v27  ;;  %v645_v32 = vpop.f32.mrf.mxu2  ;;  %vm786_vm0 = vmor %vm784_vm15, %vm785_vm14  ;;  %v805_v51 = vand.u32 2147483648, %v722_v27  ;;  %v803_v53 = vand.u32 2147483647, %v722_v27 }
 0x1e5   : > { %976 = vst [vmem:[%s1564_s18 + $0x10] sm:$0xff] %v777_v31  ;;  %v781_v33 = vsub.f32 1.0, %v780_v30  ;;  %v646_v34 = vadd.f32 %v1555_v28, %v645_v32  ;;  %vm799_vm3 = vweird.f32 %v722_v27 }
 0x1e6   : > { %v806_v59 = vor.u32 1.1754944e-38, %v805_v51  ;;  %vm804_vm5 = vcmp.eq.f32.partialorder %v803_v53, 8.507059e+37 }
 0x1e7   : > { %v782_v37 = vmul.f32 %v1246_v25, %v781_v33  ;;  %v676_v39 = vsub.f32 0.0, %v646_v34 }
 0x1e9   : > { %v1248_v40 = vpop.eup %1247  ;;  %v783_v41 = vadd.f32 %v1246_v25, %v782_v37  ;;  %v698_v42 = vmul.f32 1.442695, %v676_v39 }
 0x1ea   : > { %v1250_v43 = vpop.eup %1249  ;;  %v723_v45 = vadd.f32 1.0, %v1248_v40 }
 0x1eb   : > { %v787_v46 = vsel %vm786_vm0, %v1246_v25, %v783_v41  ;;  %v795_v35 = vmul.f32 %v1250_v43, %v722_v27  ;;  %1251 = vpow2.f32 %v698_v42  ;;  %vm800_vm2 = vweird.f32 %v1250_v43 }
 0x1ec   : > { %v792_v47 = vsel %vm789_vm1, %v791_v44, %v787_v46  ;;  %1253 = vrcp.f32 %v723_v45  ;;  %v647_v48 = vpop.f32.mrf.mxu2  ;;  %vm801_vm4 = vmor %vm799_vm3, %vm800_vm2  ;;  %v820_v3 = vand.u32 2147483648, %v723_v45  ;;  %v818_v5 = vand.u32 2147483647, %v723_v45 }
 0x1ed   : > { %977 = vst [vmem:[%s1564_s18 + $0x18] sm:$0xff] %v792_v47  ;;  %v796_v49 = vsub.f32 1.0, %v795_v35  ;;  %v648_v50 = vadd.f32 %v1555_v28, %v647_v48  ;;  %vm814_vm7 = vweird.f32 %v723_v45 }
 0x1ee   : > { %v821_v11 = vor.u32 1.1754944e-38, %v820_v3  ;;  %vm819_vm9 = vcmp.eq.f32.partialorder %v818_v5, 8.507059e+37 }
 0x1ef   : > { %v797_v52 = vmul.f32 %v1250_v43, %v796_v49  ;;  %v677_v54 = vsub.f32 0.0, %v648_v50 }
 0x1f1   : > { %v1252_v55 = vpop.eup %1251  ;;  %v798_v56 = vadd.f32 %v1250_v43, %v797_v52  ;;  %v700_v57 = vmul.f32 1.442695, %v677_v54 }
 0x1f2   : > { %v1254_v58 = vpop.eup %1253  ;;  %v724_v60 = vadd.f32 1.0, %v1252_v55 }
 0x1f3   : > { %v802_v61 = vsel %vm801_vm4, %v1250_v43, %v798_v56  ;;  %v810_v62 = vmul.f32 %v1254_v58, %v723_v45  ;;  %1255 = vpow2.f32 %v700_v57  ;;  %vm815_vm6 = vweird.f32 %v1254_v58 }
 0x1f4   : > { %v807_v63 = vsel %vm804_vm5, %v806_v59, %v802_v61  ;;  %1257 = vrcp.f32 %v724_v60  ;;  %v650_v0 = vpop.f32.mrf.mxu2  ;;  %vm816_vm8 = vmor %vm814_vm7, %vm815_vm6  ;;  %v835_v19 = vand.u32 2147483648, %v724_v60  ;;  %v833_v21 = vand.u32 2147483647, %v724_v60 }
 0x1f5   : > { %978 = vst [vmem:[%s1564_s18 + $0x20] sm:$0xff] %v807_v63  ;;  %v811_v1 = vsub.f32 1.0, %v810_v62  ;;  %v651_v2 = vadd.f32 %v1555_v28, %v650_v0  ;;  %vm829_vm11 = vweird.f32 %v724_v60 }
 0x1f6   : > { %v836_v27 = vor.u32 1.1754944e-38, %v835_v19  ;;  %vm834_vm13 = vcmp.eq.f32.partialorder %v833_v21, 8.507059e+37 }
 0x1f7   : > { %v812_v4 = vmul.f32 %v1254_v58, %v811_v1  ;;  %v678_v6 = vsub.f32 0.0, %v651_v2 }
 0x1f9   : > { %v1256_v7 = vpop.eup %1255  ;;  %v813_v8 = vadd.f32 %v1254_v58, %v812_v4  ;;  %v702_v9 = vmul.f32 1.442695, %v678_v6 }
 0x1fa   : > { %v1258_v10 = vpop.eup %1257  ;;  %v725_v12 = vadd.f32 1.0, %v1256_v7 }
 0x1fb   : > { %v817_v13 = vsel %vm816_vm8, %v1254_v58, %v813_v8  ;;  %v825_v14 = vmul.f32 %v1258_v10, %v724_v60  ;;  %1259 = vpow2.f32 %v702_v9  ;;  %vm830_vm10 = vweird.f32 %v1258_v10 }
 0x1fc   : > { %v822_v15 = vsel %vm819_vm9, %v821_v11, %v817_v13  ;;  %1261 = vrcp.f32 %v725_v12  ;;  %v652_v16 = vpop.f32.mrf.mxu2  ;;  %vm831_vm12 = vmor %vm829_vm11, %vm830_vm10  ;;  %v850_v37 = vand.u32 2147483648, %v725_v12  ;;  %v848_v39 = vand.u32 2147483647, %v725_v12 }
 0x1fd   : > { %979 = vst [vmem:[%s1564_s18 + $0x28] sm:$0xff] %v822_v15  ;;  %v826_v17 = vsub.f32 1.0, %v825_v14  ;;  %v653_v18 = vadd.f32 %v1555_v28, %v652_v16  ;;  %vm844_vm15 = vweird.f32 %v725_v12 }
 0x1fe   : > { %v851_v45 = vor.u32 1.1754944e-38, %v850_v37  ;;  %vm849_vm1 = vcmp.eq.f32.partialorder %v848_v39, 8.507059e+37 }
 0x1ff   : > { %v827_v20 = vmul.f32 %v1258_v10, %v826_v17  ;;  %v679_v22 = vsub.f32 0.0, %v653_v18 }
 0x201   : > { %v1260_v23 = vpop.eup %1259  ;;  %v828_v24 = vadd.f32 %v1258_v10, %v827_v20  ;;  %v704_v25 = vmul.f32 1.442695, %v679_v22 }
 0x202   : > { %v1262_v26 = vpop.eup %1261  ;;  %v726_v29 = vadd.f32 1.0, %v1260_v23 }
 0x203   : > { %v832_v30 = vsel %vm831_vm12, %v1258_v10, %v828_v24  ;;  %v840_v31 = vmul.f32 %v1262_v26, %v725_v12  ;;  %1263 = vpow2.f32 %v704_v25  ;;  %vm845_vm14 = vweird.f32 %v1262_v26 }
 0x204   : > { %v837_v32 = vsel %vm834_vm13, %v836_v27, %v832_v30  ;;  %1265 = vrcp.f32 %v726_v29  ;;  %v655_v33 = vpop.f32.mrf.mxu2  ;;  %vm846_vm0 = vmor %vm844_vm15, %vm845_vm14  ;;  %v865_v52 = vand.u32 2147483648, %v726_v29  ;;  %v863_v54 = vand.u32 2147483647, %v726_v29 }
 0x205   : > { %980 = vst [vmem:[%s1564_s18 + $0x30] sm:$0xff] %v837_v32  ;;  %v841_v34 = vsub.f32 1.0, %v840_v31  ;;  %v656_v36 = vadd.f32 %v1555_v28, %v655_v33  ;;  %vm859_vm3 = vweird.f32 %v726_v29 }
 0x206   : > { %v866_v60 = vor.u32 1.1754944e-38, %v865_v52  ;;  %vm864_vm5 = vcmp.eq.f32.partialorder %v863_v54, 8.507059e+37 }
 0x207   : > { %v842_v38 = vmul.f32 %v1262_v26, %v841_v34  ;;  %v680_v40 = vsub.f32 0.0, %v656_v36 }
 0x209   : > { %v1264_v41 = vpop.eup %1263  ;;  %v843_v42 = vadd.f32 %v1262_v26, %v842_v38  ;;  %v706_v43 = vmul.f32 1.442695, %v680_v40 }
 0x20a   : > { %v1266_v44 = vpop.eup %1265  ;;  %v727_v46 = vadd.f32 1.0, %v1264_v41 }
 0x20b   : > { %v847_v35 = vsel %vm846_vm0, %v1262_v26, %v843_v42  ;;  %v855_v47 = vmul.f32 %v1266_v44, %v726_v29  ;;  %1267 = vpow2.f32 %v706_v43  ;;  %vm860_vm2 = vweird.f32 %v1266_v44 }
 0x20c   : > { %v852_v48 = vsel %vm849_vm1, %v851_v45, %v847_v35  ;;  %1269 = vrcp.f32 %v727_v46  ;;  %v657_v49 = vpop.f32.mrf.mxu2  ;;  %vm861_vm4 = vmor %vm859_vm3, %vm860_vm2  ;;  %v880_v2 = vand.u32 2147483648, %v727_v46  ;;  %v878_v4 = vand.u32 2147483647, %v727_v46 }
 0x20d   : > { %981 = vst [vmem:[%s1564_s18 + $0x38] sm:$0xff] %v852_v48  ;;  %v856_v50 = vsub.f32 1.0, %v855_v47  ;;  %v658_v51 = vadd.f32 %v1555_v28, %v657_v49  ;;  %vm874_vm7 = vweird.f32 %v727_v46 }
 0x20e   : > { %v881_v8 = vor.u32 1.1754944e-38, %v880_v2  ;;  %vm879_vm9 = vcmp.eq.f32.partialorder %v878_v4, 8.507059e+37 }
 0x20f   : > { %v857_v53 = vmul.f32 %v1266_v44, %v856_v50  ;;  %v681_v55 = vsub.f32 0.0, %v658_v51 }
 0x211   : > { %v1268_v56 = vpop.eup %1267  ;;  %v858_v57 = vadd.f32 %v1266_v44, %v857_v53  ;;  %v708_v58 = vmul.f32 1.442695, %v681_v55 }
 0x212   : > { %v1270_v59 = vpop.eup %1269  ;;  %v728_v61 = vadd.f32 1.0, %v1268_v56 }
 0x213   : > { %v862_v62 = vsel %vm861_vm4, %v1266_v44, %v858_v57  ;;  %v870_v63 = vmul.f32 %v1270_v59, %v727_v46  ;;  %1271 = vpow2.f32 %v708_v58  ;;  %vm875_vm6 = vweird.f32 %v1270_v59 }
 0x214   : > { %v867_v0 = vsel %vm864_vm5, %v866_v60, %v862_v62  ;;  %1273 = vrcp.f32 %v728_v61  ;;  %vm876_vm8 = vmor %vm874_vm7, %vm875_vm6  ;;  %v895_v17 = vand.u32 2147483648, %v728_v61  ;;  %v893_v19 = vand.u32 2147483647, %v728_v61 }
 0x215   : > { %982 = vst [vmem:[%s1564_s18 + $0x40] sm:$0xff] %v867_v0  ;;  %v871_v1 = vsub.f32 1.0, %v870_v63  ;;  %vm889_vm11 = vweird.f32 %v728_v61 }
 0x216   : > { %v896_v23 = vor.u32 1.1754944e-38, %v895_v17  ;;  %vm894_vm13 = vcmp.eq.f32.partialorder %v893_v19, 8.507059e+37 }
 0x217   : > { %v872_v3 = vmul.f32 %v1270_v59, %v871_v1 }
 0x219   : > { %v1272_v5 = vpop.eup %1271  ;;  %v873_v6 = vadd.f32 %v1270_v59, %v872_v3 }
 0x21a   : > { %v1274_v7 = vpop.eup %1273  ;;  %v729_v9 = vadd.f32 1.0, %v1272_v5  ;;  %v660_v10 = vpop.f32.mrf.mxu3 }
 0x21b   : > { %v877_v11 = vsel %vm876_vm8, %v1270_v59, %v873_v6  ;;  %v885_v12 = vmul.f32 %v1274_v7, %v728_v61  ;;  %v661_v13 = vadd.f32 %v1555_v28, %v660_v10  ;;  %vm890_vm10 = vweird.f32 %v1274_v7 }
 0x21c   : > { %v882_v14 = vsel %vm879_vm9, %v881_v8, %v877_v11  ;;  %1275 = vrcp.f32 %v729_v9  ;;  %vm891_vm12 = vmor %vm889_vm11, %vm890_vm10  ;;  %v910_v32 = vand.u32 2147483648, %v729_v9  ;;  %v908_v36 = vand.u32 2147483647, %v729_v9 }
 0x21d   : > { %983 = vst [vmem:[%s1564_s18 + $0x48] sm:$0xff] %v882_v14  ;;  %v886_v15 = vsub.f32 1.0, %v885_v12  ;;  %v682_v16 = vsub.f32 0.0, %v661_v13  ;;  %vm904_vm15 = vweird.f32 %v729_v9 }
 0x21e   : > { %v911_v40 = vor.u32 1.1754944e-38, %v910_v32  ;;  %vm909_vm1 = vcmp.eq.f32.partialorder %v908_v36, 8.507059e+37 }
 0x21f   : > { %v887_v18 = vmul.f32 %v1274_v7, %v886_v15  ;;  %v710_v20 = vmul.f32 1.442695, %v682_v16 }
 0x221   : > { %v888_v21 = vadd.f32 %v1274_v7, %v887_v18  ;;  %1277 = vpow2.f32 %v710_v20 }
 0x222   : > { %v1276_v22 = vpop.eup %1275  ;;  %v662_v24 = vpop.f32.mrf.mxu3 }
 0x223   : > { %v892_v25 = vsel %vm891_vm12, %v1274_v7, %v888_v21  ;;  %v900_v26 = vmul.f32 %v1276_v22, %v729_v9  ;;  %v663_v27 = vadd.f32 %v1555_v28, %v662_v24  ;;  %vm905_vm14 = vweird.f32 %v1276_v22 }
 0x224   : > { %v897_v29 = vsel %vm894_vm13, %v896_v23, %v892_v25  ;;  %vm906_vm0 = vmor %vm904_vm15, %vm905_vm14 }
 0x225   : > { %984 = vst [vmem:[%s1564_s18 + $0x50] sm:$0xff] %v897_v29  ;;  %v901_v30 = vsub.f32 1.0, %v900_v26  ;;  %v683_v31 = vsub.f32 0.0, %v663_v27 }
 0x227   : > { %v1278_v33 = vpop.eup %1277  ;;  %v902_v34 = vmul.f32 %v1276_v22, %v901_v30  ;;  %v712_v37 = vmul.f32 1.442695, %v683_v31 }
 0x228   : > { %v730_v38 = vadd.f32 1.0, %v1278_v33 }
 0x229   : > { %v903_v39 = vadd.f32 %v1276_v22, %v902_v34  ;;  %1279 = vpow2.f32 %v712_v37 }
 0x22a   : > { %1281 = vrcp.f32 %v730_v38  ;;  %v665_v41 = vpop.f32.mrf.mxu3  ;;  %v925_v53 = vand.u32 2147483648, %v730_v38  ;;  %v923_v55 = vand.u32 2147483647, %v730_v38  ;;  %vm919_vm3 = vweird.f32 %v730_v38 }
 0x22b   : > { %v907_v42 = vsel %vm906_vm0, %v1276_v22, %v903_v39  ;;  %v666_v43 = vadd.f32 %v1555_v28, %v665_v41 }
 0x22c   : > { %v912_v44 = vsel %vm909_vm1, %v911_v40, %v907_v42  ;;  %v926_v61 = vor.u32 1.1754944e-38, %v925_v53  ;;  %vm924_vm5 = vcmp.eq.f32.partialorder %v923_v55, 8.507059e+37 }
 0x22d   : > { %985 = vst [vmem:[%s1564_s18 + $0x58] sm:$0xff] %v912_v44  ;;  %v684_v45 = vsub.f32 0.0, %v666_v43 }
 0x22f   : > { %v1280_v46 = vpop.eup %1279  ;;  %v714_v35 = vmul.f32 1.442695, %v684_v45 }
 0x230   : > { %v1282_v47 = vpop.eup %1281  ;;  %v731_v48 = vadd.f32 1.0, %v1280_v46 }
 0x231   : > { %v915_v49 = vmul.f32 %v1282_v47, %v730_v38  ;;  %1283 = vpow2.f32 %v714_v35  ;;  %vm920_vm2 = vweird.f32 %v1282_v47 }
 0x232   : > { %1285 = vrcp.f32 %v731_v48  ;;  %v667_v50 = vpop.f32.mrf.mxu3  ;;  %vm921_vm4 = vmor %vm919_vm3, %vm920_vm2  ;;  %v940_v2 = vand.u32 2147483648, %v731_v48  ;;  %v938_v4 = vand.u32 2147483647, %v731_v48  ;;  %vm934_vm7 = vweird.f32 %v731_v48 }
 0x233   : > { %v916_v51 = vsub.f32 1.0, %v915_v49  ;;  %v668_v52 = vadd.f32 %v1555_v28, %v667_v50 }
 0x234   : > { %v941_v8 = vor.u32 1.1754944e-38, %v940_v2  ;;  %vm939_vm9 = vcmp.eq.f32.partialorder %v938_v4, 8.507059e+37 }
 0x235   : > { %v917_v54 = vmul.f32 %v1282_v47, %v916_v51  ;;  %v685_v56 = vsub.f32 0.0, %v668_v52 }
 0x237   : > { %v1284_v57 = vpop.eup %1283  ;;  %v918_v58 = vadd.f32 %v1282_v47, %v917_v54  ;;  %v716_v59 = vmul.f32 1.442695, %v685_v56 }
 0x238   : > { %v1286_v60 = vpop.eup %1285  ;;  %v732_v62 = vadd.f32 1.0, %v1284_v57 }
 0x239   : > { %v922_v63 = vsel %vm921_vm4, %v1282_v47, %v918_v58  ;;  %v930_v0 = vmul.f32 %v1286_v60, %v731_v48  ;;  %1287 = vpow2.f32 %v716_v59  ;;  %vm935_vm6 = vweird.f32 %v1286_v60 }
 0x23a   : > { %v927_v1 = vsel %vm924_vm5, %v926_v61, %v922_v63  ;;  %1289 = vrcp.f32 %v732_v62  ;;  %vm936_vm8 = vmor %vm934_vm7, %vm935_vm6  ;;  %v955_v14 = vand.u32 2147483648, %v732_v62  ;;  %v953_v16 = vand.u32 2147483647, %v732_v62 }
 0x23b   : > { %986 = vst [vmem:[%s1564_s18 + $0x60] sm:$0xff] %v927_v1  ;;  %v931_v28 = vsub.f32 1.0, %v930_v0  ;;  %vm949_vm11 = vweird.f32 %v732_v62 }
 0x23c   : > { %v956_v19 = vor.u32 1.1754944e-38, %v955_v14  ;;  %vm954_vm13 = vcmp.eq.f32.partialorder %v953_v16, 8.507059e+37 }
 0x23d   : > { %v932_v3 = vmul.f32 %v1286_v60, %v931_v28 }
 0x23f   : > { %v1288_v5 = vpop.eup %1287  ;;  %v933_v6 = vadd.f32 %v1286_v60, %v932_v3 }
 0x240   : > { %v1290_v7 = vpop.eup %1289  ;;  %v733_v9 = vadd.f32 1.0, %v1288_v5 }
 0x241   : > { %v937_v10 = vsel %vm936_vm8, %v1286_v60, %v933_v6  ;;  %v945_v11 = vmul.f32 %v1290_v7, %v732_v62  ;;  %vm950_vm10 = vweird.f32 %v1290_v7 }
 0x242   : > { %v942_v12 = vsel %vm939_vm9, %v941_v8, %v937_v10  ;;  %1291 = vrcp.f32 %v733_v9  ;;  %vm951_vm12 = vmor %vm949_vm11, %vm950_vm10  ;;  %v970_v24 = vand.u32 2147483648, %v733_v9  ;;  %v968_v26 = vand.u32 2147483647, %v733_v9 }
 0x243   : > { %987 = vst [vmem:[%s1564_s18 + $0x68] sm:$0xff] %v942_v12  ;;  %v946_v13 = vsub.f32 1.0, %v945_v11  ;;  %vm964_vm15 = vweird.f32 %v733_v9 }
 0x244   : > { %v971_v29 = vor.u32 1.1754944e-38, %v970_v24  ;;  %vm969_vm1 = vcmp.eq.f32.partialorder %v968_v26, 8.507059e+37 }
 0x245   : > { %v947_v15 = vmul.f32 %v1290_v7, %v946_v13 }
 0x247   : > { %v948_v17 = vadd.f32 %v1290_v7, %v947_v15 }
 0x248   : > { %v1292_v18 = vpop.eup %1291 }
 0x249   : > { %v952_v20 = vsel %vm951_vm12, %v1290_v7, %v948_v17  ;;  %v960_v21 = vmul.f32 %v1292_v18, %v733_v9  ;;  %vm965_vm14 = vweird.f32 %v1292_v18 }
 0x24a   : > { %v957_v22 = vsel %vm954_vm13, %v956_v19, %v952_v20  ;;  %vm966_vm0 = vmor %vm964_vm15, %vm965_vm14 }
 0x24b   : > { %988 = vst [vmem:[%s1564_s18 + $0x70] sm:$0xff] %v957_v22  ;;  %v961_v23 = vsub.f32 1.0, %v960_v21 }
 0x24d   : > { %v962_v25 = vmul.f32 %v1292_v18, %v961_v23 }
 0x24f   : > { %v963_v27 = vadd.f32 %v1292_v18, %v962_v25 }
 0x251   : > { %v967_v30 = vsel %vm966_vm0, %v1292_v18, %v963_v27 }
 0x252   : > { %v972_v31 = vsel %vm969_vm1, %v971_v29, %v967_v30 }
 0x253   : > { %989 = vst [vmem:[%s1564_s18 + $0x78] sm:$0xff] %v972_v31 }
 0x254   : > { %1320 = shalt.err (!%p1317_p3)
}
 0x255   : > { %s1357_s16 = smov 128   ;;  %s1358_s18 = smov 8  }
 0x256   : > { %1185 = dma.vmem_to_hbm [thread:$0]  (%p1437_p5), %s1004_s28, 2048, %s1006_s29, %s991_s19, %s1357_s16, %s1357_s16, %s1358_s18  }
 0x257 PF: > { %p1191_p4 = scmp.ge.s32.totalorder %s1355_s27, 2  ;;  %s1020_s21 = sand.u32 1, %s1343_s24  }
 0x258   : > { %s1021_s22 = scalar_lea.sflag [#allocation3], %s1020_s21 }
 0x259   : > { %p1188_p7 = pnand %p1191_p4, %p1441_p6 }
 0x25b   : > { %p1189_p8 = pneg %p1188_p7 }
 0x25d   : > { %1338 = dma.done.wait (%p1189_p8), %s1021_s22, 2048  }
 0x25e   : > { %1340 = vsyncadd (%p1189_p8), %s1021_s22, 4294965248  ;;  %p17_p9 = scmp.ge.s32.totalorder %s1424_s30, 4   ;;  %s1638_s24 = smov %s1347_s25 }
 0x25f   : > { %s1639_s25 = smov %s1351_s26  ;;  %s1640_s26 = smov %s1435_s10 }
 0x260   : > { %s1641_s27 = smov %s1424_s30  ;;  %19 = sbr.rel (!%p17_p9) target bundleno = 3 (0x3), region = 83 }
 0x265   :  { %1027 = vsyncpa [#allocation3], 1 }
 0x266   :  { %1029 = vsyncpa [#allocation3 + $0x1], 1 }

</bundles_post_ra>
